<compile_context>
chip_gen: v7x
topology: tpu7x:2x2x1
jax: 0.10.0
libtpu: 0.0.40
codegen_flags: <defaults>
</compile_context>

<pallas_src>
import functools

import jax
import jax.numpy as jnp
from jax.experimental import pallas as pl
from jax.experimental.pallas import tpu as pltpu

EPS = 1e-5                 # nn.InstanceNorm2d default eps (biased variance)
LRELU_SLOPE = 0.01         # nn.LeakyReLU(0.01) as in ConvNormRelu
COMPUTE_DTYPE = jnp.bfloat16   # MXU / HBM-bandwidth friendly; accum stays f32

_CPARAMS = pltpu.CompilerParams(
    dimension_semantics=("parallel",),        # batch axis -> both TCs on v7x
    vmem_limit_bytes=32 * 1024 * 1024,
)


# ----------------------------------------------------------------------------
# In-kernel helpers
# ----------------------------------------------------------------------------
def _im2col(pad_ref, H, W, C):
    """Build the (H*W, 9*C) im2col matrix from a (H+2, W+2, C) padded scratch."""
    taps = []
    for ky in range(3):
        for kx in range(3):
            taps.append(pad_ref[ky:ky + H, kx:kx + W, :].reshape(H * W, C))
    return jnp.concatenate(taps, axis=-1)


def _im2col2(fpad_ref, upad_ref, H, W, C):
    """im2col over the channel-concat of two padded streams -> (H*W, 9*2C)."""
    taps = []
    for ky in range(3):
        for kx in range(3):
            taps.append(fpad_ref[ky:ky + H, kx:kx + W, :].reshape(H * W, C))
            taps.append(upad_ref[ky:ky + H, kx:kx + W, :].reshape(H * W, C))
    return jnp.concatenate(taps, axis=-1)


def _inst_norm_lrelu(acc, n_pix):
    """InstanceNorm2d (no affine, biased var) + LeakyReLU on (n_pix, C) f32."""
    inv_n = 1.0 / n_pix
    s = jnp.sum(acc, axis=0, keepdims=True)
    ss = jnp.sum(acc * acc, axis=0, keepdims=True)      # single pass stats
    mean = s * inv_n
    var = ss * inv_n - mean * mean
    y = (acc - mean) * jax.lax.rsqrt(var + EPS)
    return jnp.where(y >= 0, y, LRELU_SLOPE * y)


# ----------------------------------------------------------------------------
# Kernels
# ----------------------------------------------------------------------------
def _aux_fuse_kernel(aux_ref, se_ref, ww_ref, wb_ref, aw_ref, ab_ref, o_ref,
                     pad_ref, *, H, W, C):
    """fuse = LReLU(IN(conv3x3_w(aux))) * sigmoid(conv3x3_att(aux)) + se."""
    cdt = pad_ref.dtype
    pad_ref[...] = jnp.zeros(pad_ref.shape, cdt)
    pad_ref[1:H + 1, 1:W + 1, :] = aux_ref[0].astype(cdt)

    col = _im2col(pad_ref, H, W, C)                                  # (HW, 9C)
    w_acc = jnp.dot(col, ww_ref[...], preferred_element_type=jnp.float32) + wb_ref[...]
    a_acc = jnp.dot(col, aw_ref[...], preferred_element_type=jnp.float32) + ab_ref[...]

    wn = _inst_norm_lrelu(w_acc, H * W)
    att = jax.nn.sigmoid(a_acc)
    fuse = wn * att + se_ref[0].reshape(H * W, C).astype(jnp.float32)
    o_ref[0] = fuse.reshape(H, W, C).astype(o_ref.dtype)


def _up_concat_cb1_kernel(x_ref, fuse_ref, upw_ref, upb_ref, cw_ref, cb_ref,
                          o_ref, fpad_ref, upad_ref, *, H, W, Cin, C):
    """ConvTranspose2d(k2,s2) + concat([fuse, up]) + conv3x3 + IN + LReLU."""
    cdt = fpad_ref.dtype
    H2, W2 = 2 * H, 2 * W

    # stream 1: fused encoder output (already at 2H x 2W)
    fpad_ref[...] = jnp.zeros(fpad_ref.shape, cdt)
    fpad_ref[1:H2 + 1, 1:W2 + 1, :] = fuse_ref[0].astype(cdt)

    # stream 2: transposed conv of the previous decoder output, ONE matmul
    # upw columns are phase-major: (a*2 + b)*C + co
    x2 = x_ref[0].reshape(H * W, Cin).astype(cdt)
    y = (jnp.dot(x2, upw_ref[...], preferred_element_type=jnp.float32)
         + upb_ref[...]).astype(cdt)                                 # (HW, 4C)
    p00 = y[:, 0 * C:1 * C].reshape(H, W, C)
    p01 = y[:, 1 * C:2 * C].reshape(H, W, C)
    p10 = y[:, 2 * C:3 * C].reshape(H, W, C)
    p11 = y[:, 3 * C:4 * C].reshape(H, W, C)
    row_a0 = jnp.stack([p00, p01], axis=2).reshape(H, W2, C)   # output rows 2i
    row_a1 = jnp.stack([p10, p11], axis=2).reshape(H, W2, C)   # output rows 2i+1
    up = jnp.stack([row_a0, row_a1], axis=1).reshape(H2, W2, C)
    upad_ref[...] = jnp.zeros(upad_ref.shape, cdt)
    upad_ref[1:H2 + 1, 1:W2 + 1, :] = up

    # convblock.conv1 over concat([fuse, up]) as one K = 9*2C matmul
    col = _im2col2(fpad_ref, upad_ref, H2, W2, C)               # (4HW, 18C)
    acc = jnp.dot(col, cw_ref[...], preferred_element_type=jnp.float32) + cb_ref[...]
    out = _inst_norm_lrelu(acc, H2 * W2)
    o_ref[0] = out.reshape(H2, W2, C).astype(o_ref.dtype)


def _conv3_in_lrelu_kernel(x_ref, w_ref, b_ref, o_ref, pad_ref, *, H, W, Cin, Cout):
    """conv3x3 (pad=1) -> InstanceNorm -> LeakyReLU, single K=9*Cin matmul."""
    cdt = pad_ref.dtype
    pad_ref[...] = jnp.zeros(pad_ref.shape, cdt)
    pad_ref[1:H + 1, 1:W + 1, :] = x_ref[0].astype(cdt)
    col = _im2col(pad_ref, H, W, Cin)
    acc = jnp.dot(col, w_ref[...], preferred_element_type=jnp.float32) + b_ref[...]
    out = _inst_norm_lrelu(acc, H * W)
    o_ref[0] = out.reshape(H, W, Cout).astype(o_ref.dtype)


def _conv1x1_kernel(x_ref, w_ref, b_ref, o_ref, *, H, W, Cin, Cout):
    x2 = x_ref[0].reshape(H * W, Cin).astype(w_ref.dtype)
    y = jnp.dot(x2, w_ref[...], preferred_element_type=jnp.float32) + b_ref[...]
    o_ref[0] = y.reshape(H, W, Cout).astype(o_ref.dtype)


# ----------------------------------------------------------------------------
# pallas_call wrappers (NHWC)
# ----------------------------------------------------------------------------
def _full(shape):
    nd = len(shape)
    return pl.BlockSpec(shape, lambda n, _nd=nd: (0,) * _nd)


def aux_fuse(aux, se, ww, wb, aw, ab):
    N, H, W, C = aux.shape
    kern = functools.partial(_aux_fuse_kernel, H=H, W=W, C=C)
    return pl.pallas_call(
        kern,
        out_shape=jax.ShapeDtypeStruct((N, H, W, C), COMPUTE_DTYPE),
        grid=(N,),
        in_specs=[
            pl.BlockSpec((1, H, W, C), lambda n: (n, 0, 0, 0)),
            pl.BlockSpec((1, H, W, C), lambda n: (n, 0, 0, 0)),
            _full(ww.shape), _full(wb.shape), _full(aw.shape), _full(ab.shape),
        ],
        out_specs=pl.BlockSpec((1, H, W, C), lambda n: (n, 0, 0, 0)),
        scratch_shapes=[pltpu.VMEM((H + 2, W + 2, C), COMPUTE_DTYPE)],
        compiler_params=_CPARAMS,
    )(aux, se, ww, wb, aw, ab)


def up_concat_cb1(x, fuse, upw, upb, cw, cb):
    N, H, W, Cin = x.shape
    C = Cin // 2
    H2, W2 = 2 * H, 2 * W
    kern = functools.partial(_up_concat_cb1_kernel, H=H, W=W, Cin=Cin, C=C)
    return pl.pallas_call(
        kern,
        out_shape=jax.ShapeDtypeStruct((N, H2, W2, C), COMPUTE_DTYPE),
        grid=(N,),
        in_specs=[
            pl.BlockSpec((1, H, W, Cin), lambda n: (n, 0, 0, 0)),
            pl.BlockSpec((1, H2, W2, C), lambda n: (n, 0, 0, 0)),
            _full(upw.shape), _full(upb.shape), _full(cw.shape), _full(cb.shape),
        ],
        out_specs=pl.BlockSpec((1, H2, W2, C), lambda n: (n, 0, 0, 0)),
        scratch_shapes=[pltpu.VMEM((H2 + 2, W2 + 2, C), COMPUTE_DTYPE),
                        pltpu.VMEM((H2 + 2, W2 + 2, C), COMPUTE_DTYPE)],
        compiler_params=_CPARAMS,
    )(x, fuse, upw, upb, cw, cb)


def conv3_in_lrelu(x, w, b):
    N, H, W, Cin = x.shape
    Cout = w.shape[-1]
    kern = functools.partial(_conv3_in_lrelu_kernel, H=H, W=W, Cin=Cin, Cout=Cout)
    return pl.pallas_call(
        kern,
        out_shape=jax.ShapeDtypeStruct((N, H, W, Cout), COMPUTE_DTYPE),
        grid=(N,),
        in_specs=[pl.BlockSpec((1, H, W, Cin), lambda n: (n, 0, 0, 0)),
                  _full(w.shape), _full(b.shape)],
        out_specs=pl.BlockSpec((1, H, W, Cout), lambda n: (n, 0, 0, 0)),
        scratch_shapes=[pltpu.VMEM((H + 2, W + 2, Cin), COMPUTE_DTYPE)],
        compiler_params=_CPARAMS,
    )(x, w, b)


def conv1x1(x, w, b, out_dtype=jnp.float32):
    N, H, W, Cin = x.shape
    Cout = w.shape[-1]
    kern = functools.partial(_conv1x1_kernel, H=H, W=W, Cin=Cin, Cout=Cout)
    return pl.pallas_call(
        kern,
        out_shape=jax.ShapeDtypeStruct((N, H, W, Cout), out_dtype),
        grid=(N,),
        in_specs=[pl.BlockSpec((1, H, W, Cin), lambda n: (n, 0, 0, 0)),
                  _full(w.shape), _full(b.shape)],
        out_specs=pl.BlockSpec((1, H, W, Cout), lambda n: (n, 0, 0, 0)),
        compiler_params=_CPARAMS,
    )(x, w, b)


# ----------------------------------------------------------------------------
# Decoder: params + forward
# ----------------------------------------------------------------------------
def init_decoder_params(key, out_channels, feature_maps, levels):
    keys = iter(jax.random.split(key, 10 * levels + 2))

    def conv_hwio(kh, kw, cin, cout):
        # HWIO layout. From a PyTorch Conv2d weight (cout, cin, kh, kw) this is
        # w.permute(2, 3, 1, 0); from ConvTranspose2d (cin, cout, kh, kw) it is
        # w.permute(2, 3, 0, 1).
        return 0.05 * jax.random.normal(next(keys), (kh, kw, cin, cout), jnp.float32)

    def vec(c):
        return 0.01 * jax.random.normal(next(keys), (c,), jnp.float32)

    cdt = COMPUTE_DTYPE
    params = {}
    for i in range(levels):
        c = (2 ** (levels - i - 1)) * feature_maps
        ww, wb = conv_hwio(3, 3, c, c), vec(c)            # w%d
        aw, ab = conv_hwio(3, 3, c, c), vec(c)            # atten%d
        upw, upb = conv_hwio(2, 2, 2 * c, c), vec(c)      # upconv%d (ConvTranspose2d)
        c1w, c1b = conv_hwio(3, 3, 2 * c, c), vec(c)      # convblock%d.conv1
        c2w, c2b = conv_hwio(3, 3, c, c), vec(c)          # convblock%d.conv2
        params[f"level{i}"] = dict(
            # im2col / phase-major layouts, bf16 for the MXU, biases f32 (1, C)
            w_w=ww.reshape(9 * c, c).astype(cdt),      w_b=wb.reshape(1, c),
            att_w=aw.reshape(9 * c, c).astype(cdt),    att_b=ab.reshape(1, c),
            up_w=upw.transpose(2, 0, 1, 3).reshape(2 * c, 4 * c).astype(cdt),
            up_b=jnp.tile(upb, 4).reshape(1, 4 * c),
            cb1_w=c1w.reshape(9 * 2 * c, c).astype(cdt), cb1_b=c1b.reshape(1, c),
            cb2_w=c2w.reshape(9 * c, c).astype(cdt),     cb2_b=c2b.reshape(1, c),
        )
    params["score_w"] = (0.05 * jax.random.normal(
        next(keys), (feature_maps, out_channels), jnp.float32)).astype(cdt)
    params["score_b"] = vec(out_channels).reshape(1, out_channels)
    return params


def decoder_forward(params, inputs, self_encoder_outputs, aux_encoder_outputs, levels):
    # inputs / encoder outputs are NCHW (PyTorch convention)
    to_nhwc = lambda t: jnp.transpose(t, (0, 2, 3, 1))
    to_nchw = lambda t: jnp.transpose(t, (0, 3, 1, 2))
    cdt = COMPUTE_DTYPE

    self_rev = list(reversed(self_encoder_outputs))
    aux_rev = list(reversed(aux_encoder_outputs))

    outputs = to_nhwc(inputs).astype(cdt)
    decoder_outputs = []
    for i in range(levels):
        p = params[f"level{i}"]
        aux = to_nhwc(aux_rev[i]).astype(cdt)
        se = to_nhwc(self_rev[i]).astype(cdt)

        # w%d + atten%d + (w*a + self) fused into one kernel (reads aux once)
        fuse = aux_fuse(aux, se, p["w_w"], p["w_b"], p["att_w"], p["att_b"])
        # upconv%d + channel concat + convblock%d.conv1 (+IN+LReLU) in one kernel
        outputs = up_concat_cb1(outputs, fuse, p["up_w"], p["up_b"],
                                p["cb1_w"], p["cb1_b"])
        # convblock%d.conv2 (+IN+LReLU)
        outputs = conv3_in_lrelu(outputs, p["cb2_w"], p["cb2_b"])
        decoder_outputs.append(to_nchw(outputs).astype(jnp.float32))

    score = to_nchw(conv1x1(outputs, params["score_w"], params["score_b"]))
    return decoder_outputs, score


# ----------------------------------------------------------------------------
if __name__ == "__main__":
    # Small config consistent with the module: levels=2, feature_maps=8
    out_channels, feature_maps, levels = 2, 8, 2
    N, S = 2, 4  # batch, bottleneck spatial size

    key = jax.random.PRNGKey(0)
    k_par, k_in, k_self, k_aux = jax.random.split(key, 4)

    params = init_decoder_params(k_par, out_channels, feature_maps, levels)

    # Bottleneck input: (N, 2^levels * fm, S, S) NCHW
    inputs = jax.random.normal(k_in, (N, (2 ** levels) * feature_maps, S, S), jnp.float32)

    # Encoder skip lists, shallow -> deep (the forward reverses them internally)
    self_outs, aux_outs = [], []
    ks = jax.random.split(k_self, levels)
    ka = jax.random.split(k_aux, levels)
    for j in range(levels):
        c = (2 ** j) * feature_maps
        sp = S * (2 ** (levels - j))
        self_outs.append(jax.random.normal(ks[j], (N, c, sp, sp), jnp.float32))
        aux_outs.append(jax.random.normal(ka[j], (N, c, sp, sp), jnp.float32))

    dec_outs, score = decoder_forward(params, inputs, self_outs, aux_outs, levels)

    for d in dec_outs:
        jax.block_until_ready(d)
    jax.block_until_ready(score)

    # Shape sanity (matches PyTorch Decoder semantics)
    assert score.shape == (N, out_channels, S * (2 ** levels), S * (2 ** levels))
    assert dec_outs[0].shape == (N, (2 ** (levels - 1)) * feature_maps, 2 * S, 2 * S)
    assert dec_outs[-1].shape == (N, feature_maps, S * (2 ** levels), S * (2 ** levels))

    print("KERNEL_OK")
</pallas_src>

<mosaic_0001>
module attributes {stable_mosaic.version = 11 : i64} {
  func.func @_aux_fuse_kernel(%arg0: i32, %arg1: memref<1x8x8x16xbf16, #tpu.memory_space<vmem>>, %arg2: memref<1x8x8x16xbf16, #tpu.memory_space<vmem>>, %arg3: memref<144x16xbf16, #tpu.memory_space<vmem>>, %arg4: memref<1x16xf32, #tpu.memory_space<vmem>>, %arg5: memref<144x16xbf16, #tpu.memory_space<vmem>>, %arg6: memref<1x16xf32, #tpu.memory_space<vmem>>, %arg7: memref<1x8x8x16xbf16, #tpu.memory_space<vmem>>, %arg8: memref<10x10x16xbf16, #tpu.memory_space<vmem>>) attributes {dimension_semantics = [#tpu.dimension_semantics<parallel>], iteration_bounds = array<i64: 2>, scalar_prefetch = 0 : i64, scratch_operands = 1 : i64, tpu.core_type = #tpu.core_type<tc>, window_params = [{transform_indices = @transform_0, window_bounds = array<i64: 1, 8, 8, 16>}, {transform_indices = @transform_1, window_bounds = array<i64: 1, 8, 8, 16>}, {pipeline_mode = #tpu.pipeline_mode<synchronous>, transform_indices = @transform_2, window_bounds = array<i64: 144, 16>}, {pipeline_mode = #tpu.pipeline_mode<synchronous>, transform_indices = @transform_3, window_bounds = array<i64: 1, 16>}, {pipeline_mode = #tpu.pipeline_mode<synchronous>, transform_indices = @transform_4, window_bounds = array<i64: 144, 16>}, {pipeline_mode = #tpu.pipeline_mode<synchronous>, transform_indices = @transform_5, window_bounds = array<i64: 1, 16>}, {transform_indices = @transform_6, window_bounds = array<i64: 1, 8, 8, 16>}]} {
    %cst = arith.constant 0.000000e+00 : bf16
    %0 = vector.broadcast %cst : bf16 to vector<10x10x16xbf16>
    %c0 = arith.constant 0 : index
    %c0_0 = arith.constant 0 : index
    %c0_1 = arith.constant 0 : index
    %1 = vector.load %arg8[%c0, %c0_0, %c0_1] : memref<10x10x16xbf16, #tpu.memory_space<vmem>>, vector<10x10x16xbf16>
    tpu.vector_store %arg8[%c0, %c0_0, %c0_1], %0 {strides = array<i32>} : memref<10x10x16xbf16, #tpu.memory_space<vmem>>, vector<10x10x16xbf16>,
    %c0_2 = arith.constant 0 : index
    %c0_3 = arith.constant 0 : index
    %c0_4 = arith.constant 0 : index
    %c0_5 = arith.constant 0 : index
    %2 = vector.load %arg1[%c0_2, %c0_3, %c0_4, %c0_5] : memref<1x8x8x16xbf16, #tpu.memory_space<vmem>>, vector<1x8x8x16xbf16>
    %3 = vector.shape_cast %2 : vector<1x8x8x16xbf16> to vector<8x8x16xbf16>
    %c1 = arith.constant 1 : index
    %c1_6 = arith.constant 1 : index
    %c0_7 = arith.constant 0 : index
    %4 = vector.load %arg8[%c1, %c1_6, %c0_7] : memref<10x10x16xbf16, #tpu.memory_space<vmem>>, vector<8x8x16xbf16>
    tpu.vector_store %arg8[%c1, %c1_6, %c0_7], %3 {strides = array<i32>} : memref<10x10x16xbf16, #tpu.memory_space<vmem>>, vector<8x8x16xbf16>,
    %c0_8 = arith.constant 0 : index
    %c0_9 = arith.constant 0 : index
    %c0_10 = arith.constant 0 : index
    %5 = vector.load %arg8[%c0_8, %c0_9, %c0_10] : memref<10x10x16xbf16, #tpu.memory_space<vmem>>, vector<8x8x16xbf16>
    %6 = vector.shape_cast %5 : vector<8x8x16xbf16> to vector<64x16xbf16>
    %c0_11 = arith.constant 0 : index
    %c1_12 = arith.constant 1 : index
    %c0_13 = arith.constant 0 : index
    %7 = vector.load %arg8[%c0_11, %c1_12, %c0_13] : memref<10x10x16xbf16, #tpu.memory_space<vmem>>, vector<8x8x16xbf16>
    %8 = vector.shape_cast %7 : vector<8x8x16xbf16> to vector<64x16xbf16>
    %c0_14 = arith.constant 0 : index
    %c2 = arith.constant 2 : index
    %c0_15 = arith.constant 0 : index
    %9 = vector.load %arg8[%c0_14, %c2, %c0_15] : memref<10x10x16xbf16, #tpu.memory_space<vmem>>, vector<8x8x16xbf16>
    %10 = vector.shape_cast %9 : vector<8x8x16xbf16> to vector<64x16xbf16>
    %c1_16 = arith.constant 1 : index
    %c0_17 = arith.constant 0 : index
    %c0_18 = arith.constant 0 : index
    %11 = vector.load %arg8[%c1_16, %c0_17, %c0_18] : memref<10x10x16xbf16, #tpu.memory_space<vmem>>, vector<8x8x16xbf16>
    %12 = vector.shape_cast %11 : vector<8x8x16xbf16> to vector<64x16xbf16>
    %c1_19 = arith.constant 1 : index
    %c1_20 = arith.constant 1 : index
    %c0_21 = arith.constant 0 : index
    %13 = vector.load %arg8[%c1_19, %c1_20, %c0_21] : memref<10x10x16xbf16, #tpu.memory_space<vmem>>, vector<8x8x16xbf16>
    %14 = vector.shape_cast %13 : vector<8x8x16xbf16> to vector<64x16xbf16>
    %c1_22 = arith.constant 1 : index
    %c2_23 = arith.constant 2 : index
    %c0_24 = arith.constant 0 : index
    %15 = vector.load %arg8[%c1_22, %c2_23, %c0_24] : memref<10x10x16xbf16, #tpu.memory_space<vmem>>, vector<8x8x16xbf16>
    %16 = vector.shape_cast %15 : vector<8x8x16xbf16> to vector<64x16xbf16>
    %c2_25 = arith.constant 2 : index
    %c0_26 = arith.constant 0 : index
    %c0_27 = arith.constant 0 : index
    %17 = vector.load %arg8[%c2_25, %c0_26, %c0_27] : memref<10x10x16xbf16, #tpu.memory_space<vmem>>, vector<8x8x16xbf16>
    %18 = vector.shape_cast %17 : vector<8x8x16xbf16> to vector<64x16xbf16>
    %c2_28 = arith.constant 2 : index
    %c1_29 = arith.constant 1 : index
    %c0_30 = arith.constant 0 : index
    %19 = vector.load %arg8[%c2_28, %c1_29, %c0_30] : memref<10x10x16xbf16, #tpu.memory_space<vmem>>, vector<8x8x16xbf16>
    %20 = vector.shape_cast %19 : vector<8x8x16xbf16> to vector<64x16xbf16>
    %c2_31 = arith.constant 2 : index
    %c2_32 = arith.constant 2 : index
    %c0_33 = arith.constant 0 : index
    %21 = vector.load %arg8[%c2_31, %c2_32, %c0_33] : memref<10x10x16xbf16, #tpu.memory_space<vmem>>, vector<8x8x16xbf16>
    %22 = vector.shape_cast %21 : vector<8x8x16xbf16> to vector<64x16xbf16>
    %23 = tpu.concatenate %6, %8, %10, %12, %14, %16, %18, %20, %22 in 1 : vector<64x16xbf16>, vector<64x16xbf16>, vector<64x16xbf16>, vector<64x16xbf16>, vector<64x16xbf16>, vector<64x16xbf16>, vector<64x16xbf16>, vector<64x16xbf16>, vector<64x16xbf16> -> vector<64x144xbf16>
    %c0_34 = arith.constant 0 : index
    %c0_35 = arith.constant 0 : index
    %24 = vector.load %arg3[%c0_34, %c0_35] : memref<144x16xbf16, #tpu.memory_space<vmem>>, vector<144x16xbf16>
    %cst_36 = arith.constant dense<0.000000e+00> : vector<64x16xf32>
    %25 = tpu.matmul %23, %24, %cst_36 {dimension_numbers = #tpu.dot_dimension_numbers<[1], [0], [0], [1], [0, 0, 1, 1], [], []>} : vector<64x144xbf16>, vector<144x16xbf16>, vector<64x16xf32> -> vector<64x16xf32>
    %c0_37 = arith.constant 0 : index
    %c0_38 = arith.constant 0 : index
    %26 = vector.load %arg4[%c0_37, %c0_38] : memref<1x16xf32, #tpu.memory_space<vmem>>, vector<1x16xf32>
    %27 = vector.broadcast %26 : vector<1x16xf32> to vector<64x16xf32>
    %28 = arith.addf %25, %27 : vector<64x16xf32>
    %c0_39 = arith.constant 0 : index
    %c0_40 = arith.constant 0 : index
    %29 = vector.load %arg5[%c0_39, %c0_40] : memref<144x16xbf16, #tpu.memory_space<vmem>>, vector<144x16xbf16>
    %cst_41 = arith.constant dense<0.000000e+00> : vector<64x16xf32>
    %30 = tpu.matmul %23, %29, %cst_41 {dimension_numbers = #tpu.dot_dimension_numbers<[1], [0], [0], [1], [0, 0, 1, 1], [], []>} : vector<64x144xbf16>, vector<144x16xbf16>, vector<64x16xf32> -> vector<64x16xf32>
    %c0_42 = arith.constant 0 : index
    %c0_43 = arith.constant 0 : index
    %31 = vector.load %arg6[%c0_42, %c0_43] : memref<1x16xf32, #tpu.memory_space<vmem>>, vector<1x16xf32>
    %32 = vector.broadcast %31 : vector<1x16xf32> to vector<64x16xf32>
    %33 = arith.addf %30, %32 : vector<64x16xf32>
    %cst_44 = arith.constant dense<0.000000e+00> : vector<16xf32>
    %34 = vector.multi_reduction <add>, %28, %cst_44 [0] : vector<64x16xf32> to vector<16xf32>
    %35 = vector.shape_cast %34 : vector<16xf32> to vector<1x16xf32>
    %36 = arith.mulf %28, %28 : vector<64x16xf32>
    %cst_45 = arith.constant dense<0.000000e+00> : vector<16xf32>
    %37 = vector.multi_reduction <add>, %36, %cst_45 [0] : vector<64x16xf32> to vector<16xf32>
    %38 = vector.shape_cast %37 : vector<16xf32> to vector<1x16xf32>
    %cst_46 = arith.constant 1.562500e-02 : f32
    %39 = vector.broadcast %cst_46 : f32 to vector<1x16xf32>
    %40 = arith.mulf %35, %39 : vector<1x16xf32>
    %cst_47 = arith.constant 1.562500e-02 : f32
    %41 = vector.broadcast %cst_47 : f32 to vector<1x16xf32>
    %42 = arith.mulf %38, %41 : vector<1x16xf32>
    %43 = arith.mulf %40, %40 : vector<1x16xf32>
    %44 = arith.subf %42, %43 : vector<1x16xf32>
    %45 = vector.broadcast %40 : vector<1x16xf32> to vector<64x16xf32>
    %46 = arith.subf %28, %45 : vector<64x16xf32>
    %cst_48 = arith.constant 9.99999974E-6 : f32
    %47 = vector.broadcast %cst_48 : f32 to vector<1x16xf32>
    %48 = arith.addf %44, %47 : vector<1x16xf32>
    %49 = math.rsqrt %48 : vector<1x16xf32>
    %50 = vector.broadcast %49 : vector<1x16xf32> to vector<64x16xf32>
    %51 = arith.mulf %46, %50 : vector<64x16xf32>
    %cst_49 = arith.constant 0.000000e+00 : f32
    %52 = vector.broadcast %cst_49 : f32 to vector<64x16xf32>
    %53 = arith.cmpf oge, %51, %52 : vector<64x16xf32>
    %cst_50 = arith.constant 0.00999999977 : f32
    %54 = vector.broadcast %cst_50 : f32 to vector<64x16xf32>
    %55 = arith.mulf %54, %51 : vector<64x16xf32>
    %56 = arith.select %53, %51, %55 : vector<64x16xi1>, vector<64x16xf32>
    %57 = arith.negf %33 : vector<64x16xf32>
    %58 = math.exp %57 : vector<64x16xf32>
    %cst_51 = arith.constant 1.000000e+00 : f32
    %59 = vector.broadcast %cst_51 : f32 to vector<64x16xf32>
    %60 = arith.addf %59, %58 : vector<64x16xf32>
    %61 = arith.divf %59, %60 : vector<64x16xf32>
    %62 = arith.mulf %56, %61 : vector<64x16xf32>
    %c0_52 = arith.constant 0 : index
    %c0_53 = arith.constant 0 : index
    %c0_54 = arith.constant 0 : index
    %c0_55 = arith.constant 0 : index
    %63 = vector.load %arg2[%c0_52, %c0_53, %c0_54, %c0_55] : memref<1x8x8x16xbf16, #tpu.memory_space<vmem>>, vector<1x8x8x16xbf16>
    %64 = vector.shape_cast %63 : vector<1x8x8x16xbf16> to vector<8x8x16xbf16>
    %65 = vector.shape_cast %64 : vector<8x8x16xbf16> to vector<64x16xbf16>
    %66 = arith.extf %65 : vector<64x16xbf16> to vector<64x16xf32>
    %67 = arith.addf %62, %66 : vector<64x16xf32>
    %68 = vector.shape_cast %67 : vector<64x16xf32> to vector<8x8x16xf32>
    %69 = arith.truncf %68 : vector<8x8x16xf32> to vector<8x8x16xbf16>
    %c0_56 = arith.constant 0 : index
    %c0_57 = arith.constant 0 : index
    %c0_58 = arith.constant 0 : index
    %c0_59 = arith.constant 0 : index
    %70 = vector.load %arg7[%c0_56, %c0_57, %c0_58, %c0_59] : memref<1x8x8x16xbf16, #tpu.memory_space<vmem>>, vector<1x8x8x16xbf16>
    %71 = vector.shape_cast %70 : vector<1x8x8x16xbf16> to vector<8x8x16xbf16>
    %72 = vector.shape_cast %69 : vector<8x8x16xbf16> to vector<1x8x8x16xbf16>
    tpu.vector_store %arg7[%c0_56, %c0_57, %c0_58, %c0_59], %72 {strides = array<i32>} : memref<1x8x8x16xbf16, #tpu.memory_space<vmem>>, vector<1x8x8x16xbf16>,
    return
  }
  func.func @transform_0(%arg0: i32) -> (i32, i32, i32, i32) {
    %c0_i32 = arith.constant 0 : i32
    %c0_i32_0 = arith.constant 0 : i32
    %c0_i32_1 = arith.constant 0 : i32
    %c0_i32_2 = arith.constant 0 : i32
    return %arg0, %c0_i32, %c0_i32_0, %c0_i32_1 : i32, i32, i32, i32
  }
  func.func @transform_1(%arg0: i32) -> (i32, i32, i32, i32) {
    %c0_i32 = arith.constant 0 : i32
    %c0_i32_0 = arith.constant 0 : i32
    %c0_i32_1 = arith.constant 0 : i32
    %c0_i32_2 = arith.constant 0 : i32
    return %arg0, %c0_i32, %c0_i32_0, %c0_i32_1 : i32, i32, i32, i32
  }
  func.func @transform_2(%arg0: i32) -> (i32, i32) {
    %c0_i32 = arith.constant 0 : i32
    %c0_i32_0 = arith.constant 0 : i32
    %c0_i32_1 = arith.constant 0 : i32
    return %c0_i32, %c0_i32_0 : i32, i32
  }
  func.func @transform_3(%arg0: i32) -> (i32, i32) {
    %c0_i32 = arith.constant 0 : i32
    %c0_i32_0 = arith.constant 0 : i32
    %c0_i32_1 = arith.constant 0 : i32
    return %c0_i32, %c0_i32_0 : i32, i32
  }
  func.func @transform_4(%arg0: i32) -> (i32, i32) {
    %c0_i32 = arith.constant 0 : i32
    %c0_i32_0 = arith.constant 0 : i32
    %c0_i32_1 = arith.constant 0 : i32
    return %c0_i32, %c0_i32_0 : i32, i32
  }
  func.func @transform_5(%arg0: i32) -> (i32, i32) {
    %c0_i32 = arith.constant 0 : i32
    %c0_i32_0 = arith.constant 0 : i32
    %c0_i32_1 = arith.constant 0 : i32
    return %c0_i32, %c0_i32_0 : i32, i32
  }
  func.func @transform_6(%arg0: i32) -> (i32, i32, i32, i32) {
    %c0_i32 = arith.constant 0 : i32
    %c0_i32_0 = arith.constant 0 : i32
    %c0_i32_1 = arith.constant 0 : i32
    %c0_i32_2 = arith.constant 0 : i32
    return %arg0, %c0_i32, %c0_i32_0, %c0_i32_1 : i32, i32, i32, i32
  }
}

</mosaic_0001>

<bundles_post_ra>
// kernel: tpu_custom_call.1
= control target key start
LH: loop header
LB: loop body
LE: loop exit
PB: predicated region body
PF: predicated region fallthrough
CT: control target
= control target key end

     0   :  { %11 = vsyncpa [#allocation4], 0  ;;  %s3036_s0 = inlined_call_operand.vmem [shape: bf16[2,8,8,16], index: 0, kind: input, shape index: {}]   ;;  %s3037_s1 = inlined_call_operand.vmem [shape: bf16[2,8,8,16], index: 1, kind: input, shape index: {}]   ;;  %s3038_s2 = inlined_call_operand.vmem [shape: bf16[144,16], index: 2, kind: input, shape index: {}]   ;;  %s3039_s3 = inlined_call_operand.vmem [shape: f32[1,16], index: 3, kind: input, shape index: {}]   ;;  %s3040_s4 = inlined_call_operand.vmem [shape: bf16[144,16], index: 4, kind: input, shape index: {}]   ;;  %s3041_s5 = inlined_call_operand.vmem [shape: f32[1,16], index: 5, kind: input, shape index: {}]   ;;  %s3042_s6 = inlined_call_operand.hbm [shape: bf16[2,8,8,16], index: 6, kind: output, shape index: {}]  }
   0x1   :  { %13 = vsyncpa [#allocation4 + $0x1], 0  ;;  %s2187_s21 = smov 0   ;;  %s2189_s22 = smov 0  }
   0x2   :  { %s2191_s23 = smov 0   ;;  %s2193_s24 = smov 0  }
   0x3 LB: > { %s2208_s25 = sadd.s32 4294967295, %s2140_s24   ;;  %s1834_s26 = sadd.s32 4294967294, %s2140_s24   ;;  %s2140_s24 = sphi %s2193_s24, %s3056_s24   ;;  %s2136_s23 = sphi %s2191_s23, %s3055_s23   ;;  %s2132_s22 = sphi %s2189_s22, %s3054_s22   ;;  %s2128_s21 = sphi %s2187_s21, %s3053_s21  }
   0x4   : > { %s2212_s27 = sadd.s32 1, %s2140_s24   ;;  %s162_s28 = sadd.s32 1, %s2136_s23 }
   0x5   : > { %s159_s29 = ssub.s32 %s2140_s24, %s2212_s27  ;;  %p172_p0 = scmp.ne.s32.totalorder %s2136_s23, %s2132_s22 }
   0x6   : > { %p160_p1 = scmp.eq.s32.totalorder %s159_s29, 0  ;;  %p173_p2 = scmp.eq.s32.totalorder %s2208_s25, 1 }
   0x7   : > { %p178_p3 = scmp.ne.s32.totalorder %s2132_s22, %s2128_s21  ;;  %p179_p4 = scmp.eq.s32.totalorder %s1834_s26, 1 }
   0x8   : > { %s2223_s30 = scalar_select %p160_p1, %s2136_s23, %s162_s28  }
   0x9   : > { %p2225_p5 = por %p173_p2, %p172_p0  ;;  %p2229_p6 = por %p179_p4, %p178_p3 }
   0xa   : > { %p1837_p7 = scmp.ge.s32.totalorder %s2140_s24, 1  ;;  %p225_p8 = scmp.lt.s32.totalorder %s2140_s24, 3 }
   0xc   : > { %p226_p9 = pnand %p1837_p7, %p225_p8 }
   0xd   : > { %p260_p10 = scmp.lt.s32.totalorder (!%p226_p9), %s2208_s25, 1  ;;  %vm271_vm0 = vcmask (!%p226_p9), 125952   ;;  %v2142_v0 = vmov (!%p226_p9), 0   ;;  %vm273_vm1 = vcmask (!%p226_p9), 122880   ;;  %v2022_v1 = vld [vmem:[%s3038_s2] sm:$0xff] (!%p226_p9)   ;;  %vm591_vm4 = vcmask (!%p226_p9), 1042432  }
   0xe   : > { %229 = sbr.rel (%p226_p9) target bundleno = 525 (0x20d), region = 44  ;;  %281 = vst.msk [vmem:[#allocation2 + $0x20] sm:$0xf] (!%p226_p9), %vm271_vm0, %v2142_v0  ;;  %283 = vst.msk [vmem:[#allocation2 + $0x28] sm:$0xf] (!%p226_p9), %vm271_vm0, %v2142_v0  ;;  %1345 = vmatprep.subr.bf16.mxu0 (!%p226_p9), %v2142_v0  ;;  %1489 = vmatprep.subr.bf16.mxu1 (!%p226_p9), %v2142_v0  ;;  %v2023_v2 = vld [vmem:[%s3040_s4] sm:$0xff] (!%p226_p9)  }
   0xf   : > { %272 = vst.msk [vmem:[#allocation2] sm:$0xf] (!%p226_p9), %vm271_vm0, %v2142_v0  ;;  %275 = vst.msk [vmem:[#allocation2 + $0x8] sm:$0xf] (!%p226_p9), %vm271_vm0, %v2142_v0  ;;  %vm383_vm2 = vsmask.f32 (!%p226_p9), 7938  ;;  %1346 = vmatpush1.bf16.msra.mxu0 (!%p226_p9), %v2022_v1  ;;  %1490 = vmatpush1.bf16.msra.mxu1 (!%p226_p9), %v2023_v2 }
  0x10   : > { %277 = vst.msk [vmem:[#allocation2 + $0x10] sm:$0xf] (!%p226_p9), %vm271_vm0, %v2142_v0  ;;  %279 = vst.msk [vmem:[#allocation2 + $0x18] sm:$0xf] (!%p226_p9), %vm271_vm0, %v2142_v0  ;;  %1347 = vmatprep.subr.bf16.mxu0 (!%p226_p9), %v2142_v0  ;;  %vm389_vm3 = vsmask.f32 (!%p226_p9), 256  ;;  %1491 = vmatprep.subr.bf16.mxu1 (!%p226_p9), %v2142_v0 }
  0x11   : > { %285 = vst.msk [vmem:[#allocation2 + $0x30] sm:$0xf] (!%p226_p9), %vm271_vm0, %v2142_v0  ;;  %287 = vst.msk [vmem:[#allocation2 + $0x38] sm:$0xf] (!%p226_p9), %vm271_vm0, %v2142_v0  ;;  %vm592_vm5 = vcmask (!%p226_p9), 1046532   ;;  %v2024_v34 = vld [vmem:[%s3038_s2 + $0x8] sm:$0xff] (!%p226_p9)  }
  0x12   : > { %289 = vst.msk [vmem:[#allocation2 + $0x40] sm:$0xf] (!%p226_p9), %vm271_vm0, %v2142_v0  ;;  %291 = vst.msk [vmem:[#allocation2 + $0x48] sm:$0xf] (!%p226_p9), %vm271_vm0, %v2142_v0  ;;  %v2025_v54 = vld [vmem:[%s3040_s4 + $0x8] sm:$0xff] (!%p226_p9)   ;;  %s2143_s18 = smov (!%p226_p9), 96  }
  0x13   : > { %274 = vst.msk [vmem:[#allocation2 + $0x4] sm:$0x1] (!%p226_p9), %vm273_vm1, %v2142_v0  ;;  %276 = vst.msk [vmem:[#allocation2 + $0xc] sm:$0x1] (!%p226_p9), %vm273_vm1, %v2142_v0  ;;  %1348 = vmatpush1.bf16.msra.mxu0 (!%p226_p9), %v2024_v34  ;;  %1492 = vmatpush1.bf16.msra.mxu1 (!%p226_p9), %v2025_v54  ;;  %s2144_s26 = smov (!%p226_p9), 48   ;;  %s2145_s19 = smov (!%p226_p9), 32  }
  0x14   : > { %278 = vst.msk [vmem:[#allocation2 + $0x14] sm:$0x1] (!%p226_p9), %vm273_vm1, %v2142_v0  ;;  %280 = vst.msk [vmem:[#allocation2 + $0x1c] sm:$0x1] (!%p226_p9), %vm273_vm1, %v2142_v0  ;;  %1349 = vmatprep.subr.bf16.mxu0 (!%p226_p9), %v2142_v0  ;;  %1493 = vmatprep.subr.bf16.mxu1 (!%p226_p9), %v2142_v0  ;;  %vm452_vm9 = vsmask.f32 (!%p226_p9), 3328 }
  0x15   : > { %s2261_s9 = scalar_select %p260_p10, %s2208_s25, 1  ;;  %282 = vst.msk [vmem:[#allocation2 + $0x24] sm:$0x1] %vm273_vm1, %v2142_v0  ;;  %284 = vst.msk [vmem:[#allocation2 + $0x2c] sm:$0x1] %vm273_vm1, %v2142_v0  ;;  %vm1183_vm12 = vcmask 130048  }
  0x16   : > { %286 = vst.msk [vmem:[#allocation2 + $0x34] sm:$0x1] %vm273_vm1, %v2142_v0  ;;  %288 = vst.msk [vmem:[#allocation2 + $0x3c] sm:$0x1] %vm273_vm1, %v2142_v0  ;;  %v406_v15 = vld [vmem:[#allocation2 + $0x20] sm:$0xf] }
  0x17   : > { %290 = vst.msk [vmem:[#allocation2 + $0x44] sm:$0x1] %vm273_vm1, %v2142_v0  ;;  %292 = vst.msk [vmem:[#allocation2 + $0x4c] sm:$0x1] %vm273_vm1, %v2142_v0  ;;  %s1944_s12 = sshll.u32 %s2261_s9, 5  ;;  %s2146_s20 = smov 80  }
  0x18   : > { %s2292_s15 = scalar_lea.vmem %s3036_s0, %s1944_s12  ;;  %vm2307_vm6 = vmand %vm271_vm0, %vm383_vm2  ;;  %v412_v18 = vld [vmem:[#allocation2 + $0x28] sm:$0xf]  ;;  %v394_v31 = vld [vmem:[#allocation2 + $0x10] sm:$0xf]  ;;  %vm453_vm10 = vsmask.f32 7440  ;;  %s269_s17 = scalar_lea.vmem %s3037_s1, %s1944_s12 }
  0x19   : > { %v296_v3 = vld [vmem:[%s2292_s15 + $0xc] sm:$0xf]  ;;  %v297_v4 = vld [vmem:[%s2292_s15 + $0x10] sm:$0xf]  ;;  %v293_v5 = vld [vmem:[%s2292_s15] sm:$0xf] }
  0x1a   : > { %v326_v6 = vshrl.u32 %v296_v3, 16  ;;  %v329_v7 = vshll.u32 %v296_v3, 16  ;;  %v334_v8 = vshrl.u32 %v297_v4, 16  ;;  %v337_v9 = vshll.u32 %v297_v4, 16  ;;  %v294_v10 = vld [vmem:[%s2292_s15 + $0x4] sm:$0xf]  ;;  %vm2317_vm7 = vmand %vm273_vm1, %vm389_vm3 }
  0x1b   : > { %v302_v11 = vshrl.u32 %v293_v5, 16  ;;  %v305_v12 = vshll.u32 %v293_v5, 16  ;;  %v310_v16 = vshrl.u32 %v294_v10, 16  ;;  %v313_v20 = vshll.u32 %v294_v10, 16  ;;  %v298_v21 = vld [vmem:[%s2292_s15 + $0x14] sm:$0xf]  ;;  %vm2354_vm8 = vmor %vm591_vm4, %vm592_vm5 }
  0x1c   : > { %v328_v13 = vrot.slane %v326_v6, 7  ;;  %v2303_v14 = vrot.slane %v334_v8, 7  ;;  %v385_v26 = vld [vmem:[#allocation2 + $0x8] sm:$0xf]  ;;  %v342_v32 = vshrl.u32 %v298_v21, 16  ;;  %v345_v37 = vshll.u32 %v298_v21, 16  ;;  %vm2517_vm11 = vmor %vm452_vm9, %vm453_vm10 }
  0x1d   : > { %v304_v19 = vrot.slane %v302_v11, 7  ;;  %v295_v27 = vld [vmem:[%s2292_s15 + $0x8] sm:$0xf]  ;;  %v312_v30 = vrot.slane %v310_v16, 7  ;;  %v418_v38 = vld [vmem:[#allocation2 + $0x30] sm:$0xf] }
  0x1e   : > { %v331_v22 = vor.u32 %v329_v7, %v328_v13  ;;  %v332_v23 = vrot.slane %v328_v13, 4  ;;  %v339_v24 = vor.u32 %v337_v9, %v2303_v14  ;;  %v340_v25 = vrot.slane %v2303_v14, 4  ;;  %v391_v40 = vld [vmem:[#allocation2 + $0xc] sm:$0x1]  ;;  %v2328_v41 = vld [vmem:[#allocation2 + $0x4] sm:$0x1] }
  0x1f   : > { %v307_v28 = vor.u32 %v305_v12, %v304_v19  ;;  %v308_v29 = vrot.slane %v304_v19, 4  ;;  %v318_v39 = vshrl.u32 %v295_v27, 16  ;;  %v315_v42 = vor.u32 %v313_v20, %v312_v30  ;;  %v400_v46 = vld [vmem:[#allocation2 + $0x18] sm:$0xf]  ;;  %v567_v47 = vld [vmem:[#allocation2] sm:$0xe] }
  0x20   : > { %v407_v35 = vsel %vm2307_vm6, %v331_v22, %v406_v15  ;;  %v413_v36 = vsel %vm2307_vm6, %v339_v24, %v412_v18  ;;  %v316_v43 = vrot.slane %v312_v30, 4  ;;  %v344_v45 = vrot.slane %v342_v32, 7  ;;  %v403_v48 = vld [vmem:[#allocation2 + $0x1c] sm:$0x1]  ;;  %v409_v53 = vld [vmem:[#allocation2 + $0x24] sm:$0x1] }
  0x21   : > { %408 = vst [vmem:[#allocation2 + $0x20] sm:$0xf] %v407_v35  ;;  %414 = vst [vmem:[#allocation2 + $0x28] sm:$0xf] %v413_v36  ;;  %v386_v44 = vsel %vm2307_vm6, %v307_v28, %v385_v26  ;;  %v320_v49 = vrot.slane %v318_v39, 7  ;;  %v321_v50 = vshll.u32 %v295_v27, 16  ;;  %v392_v51 = vsel %vm2317_vm7, %v308_v29, %v391_v40 }
  0x22   : > { %387 = vst [vmem:[#allocation2 + $0x8] sm:$0xf] %v386_v44  ;;  %v1843_v52 = vrot.slane %v567_v47, 9  ;;  %v395_v55 = vsel %vm2307_vm6, %v315_v42, %v394_v31  ;;  %v347_v56 = vor.u32 %v345_v37, %v344_v45  ;;  %v348_v57 = vrot.slane %v344_v45, 4  ;;  %393 = vst [vmem:[#allocation2 + $0xc] sm:$0x1] %v392_v51 }
  0x23   : > { %v596_v58 = vrot.slane %v2328_v41, 5  ;;  %v397_v59 = vld [vmem:[#allocation2 + $0x14] sm:$0x1]  ;;  %v415_v60 = vld [vmem:[#allocation2 + $0x2c] sm:$0x1]  ;;  %v323_v61 = vor.u32 %v321_v50, %v320_v49  ;;  %v324_v62 = vrot.slane %v320_v49, 4  ;;  %v410_v63 = vsel %vm2317_vm7, %v332_v23, %v409_v53 }
  0x24   : > { %396 = vst [vmem:[#allocation2 + $0x10] sm:$0xf] %v395_v55  ;;  %v398_v1 = vsel %vm2317_vm7, %v316_v43, %v397_v59  ;;  %v2345_v2 = vld [vmem:[#allocation2] sm:$0xf]  ;;  %v421_v3 = vld [vmem:[#allocation2 + $0x34] sm:$0x1]  ;;  %v419_v5 = vsel %vm2307_vm6, %v347_v56, %v418_v38  ;;  %v416_v7 = vsel %vm2317_vm7, %v340_v25, %v415_v60 }
  0x25   : > { %v2026_v4 = vld [vmem:[%s3038_s2 + $0x10] sm:$0xff]   ;;  %411 = vst [vmem:[#allocation2 + $0x24] sm:$0x1] %v410_v63  ;;  %399 = vst [vmem:[#allocation2 + $0x14] sm:$0x1] %v398_v1  ;;  %v456_v8 = vshrl.u32 %v2345_v2, 16  ;;  %v401_v11 = vsel %vm2307_vm6, %v323_v61, %v400_v46  ;;  %v404_v12 = vsel %vm2317_vm7, %v324_v62, %v403_v48  ;;  %v422_v16 = vsel %vm2317_vm7, %v348_v57, %v421_v3 }
  0x26   : > { %v2362_v9 = vld [vmem:[%s2292_s15 + $0x18] sm:$0xf]  ;;  %v2027_v10 = vld [vmem:[%s3040_s4 + $0x10] sm:$0xff]   ;;  %420 = vst [vmem:[#allocation2 + $0x30] sm:$0xf] %v419_v5  ;;  %v459_v13 = vshll.u32 %v2345_v2, 16  ;;  %1350 = vmatpush1.bf16.msra.mxu0 %v2026_v4  ;;  %v2387_v23 = vsel %vm2354_vm8, %v1843_v52, %v596_v58 }
  0x27   : > { %417 = vst [vmem:[#allocation2 + $0x2c] sm:$0x1] %v416_v7  ;;  %402 = vst [vmem:[#allocation2 + $0x18] sm:$0xf] %v401_v11  ;;  %v2373_v14 = vrot.slane %v456_v8, 4  ;;  %v465_v15 = vshll.u32 %v2328_v41, 16  ;;  %1351 = vmatprep.subr.bf16.mxu0 %v2142_v0  ;;  %1494 = vmatpush1.bf16.msra.mxu1 %v2027_v10 }
  0x28   : > { %405 = vst [vmem:[#allocation2 + $0x1c] sm:$0x1] %v404_v12  ;;  %v350_v18 = vshrl.u32 %v2362_v9, 16  ;;  %v2028_v19 = vld [vmem:[%s3038_s2 + $0x18] sm:$0xff]   ;;  %v813_v20 = vld [vmem:[#allocation2 + $0x20] sm:$0xf]  ;;  %1495 = vmatprep.subr.bf16.mxu1 %v2142_v0 }
  0x29   : > { %v814_v21 = vld [vmem:[#allocation2 + $0x28] sm:$0xf]  ;;  %423 = vst [vmem:[#allocation2 + $0x34] sm:$0x1] %v422_v16  ;;  %v856_v27 = vshrl.u32 %v813_v20, 16  ;;  %v2029_v29 = vld [vmem:[%s3040_s4 + $0x18] sm:$0xff]  }
  0x2a   : > { %v2383_v22 = vld [vmem:[#allocation2 + $0x28] sm:$0xf]  ;;  %v870_v24 = vshrl.u32 %v814_v21, 16  ;;  %v873_v25 = vshll.u32 %v814_v21, 16  ;;  %v1892_v26 = vcombine.low %v813_v20, %v814_v21  ;;  %v859_v30 = vshll.u32 %v813_v20, 16  ;;  %1352 = vmatpush1.bf16.msra.mxu0 %v2028_v19  ;;  %v2030_v50 = vld [vmem:[%s3038_s2 + $0x20] sm:$0xff]  }
  0x2b   : > { %v626_v28 = vld [vmem:[#allocation2 + $0x8] sm:$0xf]  ;;  %v699_v34 = vshrl.u32 %v2383_v22, 16  ;;  %v858_v37 = vrot.slane %v856_v27, 4  ;;  %v627_v38 = vld [vmem:[#allocation2 + $0x10] sm:$0xf]  ;;  %1353 = vmatprep.subr.bf16.mxu0 %v2142_v0  ;;  %1496 = vmatpush1.bf16.msra.mxu1 %v2029_v29 }
  0x2c   : > { %v643_v31 = vshrl.u32 %v626_v28, 16  ;;  %v646_v32 = vshll.u32 %v626_v28, 16  ;;  %v872_v35 = vrot.slane %v870_v24, 4  ;;  %v875_v36 = vrot.slane %v873_v25, 5  ;;  %1145 = vrot.lane.b32.xlu0 %v1892_v26, %s2143_s18  ;;  %1497 = vmatprep.subr.bf16.mxu1 %v2142_v0  ;;  %v2031_v55 = vld [vmem:[%s3040_s4 + $0x20] sm:$0xff]   ;;  %s2147_s16 = smov 64  }
  0x2d   : > { %v702_v39 = vshll.u32 %v2383_v22, 16  ;;  %v861_v40 = vrot.slane %v859_v30, 5  ;;  %v657_v42 = vshrl.u32 %v627_v38, 16  ;;  %v660_v43 = vshll.u32 %v627_v38, 16  ;;  %v2397_v48 = vld [vmem:[#allocation2 + $0x30] sm:$0xf] }
  0x2e   : > { %v1879_v44 = vcombine.low %v626_v28, %v627_v38  ;;  %v876_v45 = vor.u32 %v875_v36, %v872_v35  ;;  %v645_v46 = vrot.slane %v643_v31, 4  ;;  %v648_v47 = vrot.slane %v646_v32, 5  ;;  %v811_v60 = vld [vmem:[#allocation2 + $0x10] sm:$0xf]  ;;  %1354 = vmatpush1.bf16.msra.mxu0 %v2030_v50  ;;  %v812_v1 = vld [vmem:[#allocation2 + $0x18] sm:$0xf] }
  0x2f   : > { %v353_v49 = vshll.u32 %v2362_v9, 16  ;;  %v862_v51 = vor.u32 %v861_v40, %v858_v37  ;;  %v659_v52 = vrot.slane %v657_v42, 4  ;;  %v662_v53 = vrot.slane %v660_v43, 5  ;;  %v628_v4 = vld [vmem:[#allocation2 + $0x18] sm:$0xf]  ;;  %1498 = vmatpush1.bf16.msra.mxu1 %v2031_v55  ;;  %1355 = vmatprep.subr.bf16.mxu0 %v2142_v0  ;;  %v2032_v31 = vld [vmem:[%s3038_s2 + $0x28] sm:$0xff]  }
  0x30   : > { %1075 = vrot.lane.b32.xlu1 %v1879_v44, %s2144_s26  ;;  %v2405_v54 = vrot.slane %v699_v34, 4  ;;  %v2410_v56 = vrot.slane %v876_v45, 4  ;;  %v649_v57 = vor.u32 %v648_v47, %v645_v46  ;;  %v2412_v58 = vrot.slane %v702_v39, 5  ;;  %v629_v5 = vld [vmem:[#allocation2 + $0x20] sm:$0xf]  ;;  %1499 = vmatprep.subr.bf16.mxu1 %v2142_v0  ;;  %v2033_v44 = vld [vmem:[%s3040_s4 + $0x28] sm:$0xff]  }
  0x31   : > { %v713_v59 = vshrl.u32 %v2397_v48, 16  ;;  %v663_v61 = vor.u32 %v662_v53, %v659_v52  ;;  %v716_v62 = vshll.u32 %v2397_v48, 16  ;;  %v1881_v63 = vcombine.low %v2383_v22, %v2397_v48  ;;  %v2425_v12 = vld [vmem:[#allocation2 + $0xc] sm:$0x1]  ;;  %v568_v16 = vld [vmem:[#allocation2 + $0x8] sm:$0xe] }
  0x32   : > { %v828_v3 = vshrl.u32 %v811_v60, 16  ;;  %v2419_v7 = vrot.slane %v862_v51, 4  ;;  %v2421_v8 = vrot.slane %v649_v57, 4  ;;  %v831_v11 = vshll.u32 %v811_v60, 16  ;;  %v2433_v24 = vld [vmem:[#allocation2 + $0x1c] sm:$0x1]  ;;  %1356 = vmatpush1.bf16.msra.mxu0 %v2032_v31 }
  0x33   : > { %v2423_v10 = vrot.slane %v713_v59, 4  ;;  %v2428_v19 = vrot.slane %v663_v61, 4  ;;  %1079 = vrot.lane.b32.xlu0 %v1881_v63, %s2144_s26  ;;  %v842_v21 = vshrl.u32 %v812_v1, 16  ;;  %v845_v22 = vshll.u32 %v812_v1, 16  ;;  %v2435_v25 = vld [vmem:[#allocation2 + $0x24] sm:$0x1]  ;;  %1357 = vmatprep.subr.bf16.mxu0 %v2142_v0 }
  0x34   : > { %v2431_v20 = vrot.slane %v828_v3, 4  ;;  %v2437_v26 = vrot.slane %v831_v11, 5  ;;  %v1891_v27 = vcombine.low %v811_v60, %v812_v1  ;;  %v671_v28 = vshrl.u32 %v628_v4, 16  ;;  %v756_v30 = vld [vmem:[#allocation2 + $0x18] sm:$0xe]  ;;  %1500 = vmatpush1.bf16.msra.mxu1 %v2033_v44  ;;  %s2148_s11 = smov 16  }
  0x35   : > { %v674_v29 = vshll.u32 %v628_v4, 16  ;;  %v2442_v32 = vrot.slane %v842_v21, 4  ;;  %v2444_v34 = vrot.slane %v845_v22, 5  ;;  %v685_v35 = vshrl.u32 %v629_v5, 16  ;;  %v757_v37 = vld [vmem:[#allocation2 + $0x20] sm:$0xe]  ;;  %1501 = vmatprep.subr.bf16.mxu1 %v2142_v0 }
  0x36   : > { %v688_v36 = vshll.u32 %v629_v5, 16  ;;  %1143 = vrot.lane.b32.xlu1 %v1891_v27, %s2143_s18  ;;  %v2447_v38 = vrot.slane %v671_v28, 4  ;;  %v1880_v40 = vcombine.low %v628_v4, %v629_v5  ;;  %v1844_v42 = vrot.slane %v568_v16, 9  ;;  %v2451_v43 = vld [vmem:[#allocation2 + $0xc] sm:$0x1]  ;;  %v2034_v28 = vld [vmem:[%s3038_s2 + $0x30] sm:$0xff]  }
  0x37   : > { %v2449_v39 = vrot.slane %v674_v29, 5  ;;  %v2456_v45 = vrot.slane %v685_v35, 4  ;;  %v600_v47 = vrot.slane %v2425_v12, 5  ;;  %v1853_v50 = vrot.slane %v756_v30, 9  ;;  %v2461_v51 = vld [vmem:[#allocation2 + $0x14] sm:$0x1]  ;;  %1358 = vmatpush1.bf16.msra.mxu0 %v2034_v28 }
  0x38   : > { %v2458_v46 = vrot.slane %v688_v36, 5  ;;  %v788_v52 = vrot.slane %v2433_v24, 5  ;;  %v1854_v53 = vrot.slane %v757_v37, 9  ;;  %v792_v55 = vrot.slane %v2435_v25, 5  ;;  %v754_v57 = vld [vmem:[#allocation2 + $0x8] sm:$0xe]  ;;  %1359 = vmatprep.subr.bf16.mxu0 %v2142_v0 }
  0x39   : > { %v780_v59 = vrot.slane %v2451_v43, 5  ;;  %v601_v60 = vsel %vm2354_vm8, %v1844_v42, %v600_v47  ;;  %v755_v61 = vld [vmem:[#allocation2 + $0x10] sm:$0xe]  ;;  %v1851_v63 = vrot.slane %v754_v57, 9  ;;  %v784_v1 = vrot.slane %v2461_v51, 5  ;;  %s2149_s13 = smov 112  }
  0x3a   : > { %v2470_v3 = vld [vmem:[#allocation2 + $0x24] sm:$0x1]  ;;  %v834_v4 = vor.u32 %v2437_v26, %v2431_v20  ;;  %1077 = vrot.lane.b32.xlu1 %v1880_v40, %s2144_s26  ;;  %v1875_v5 = vcombine.low %v2387_v23, %v601_v60  ;;  %v789_v11 = vsel %vm2354_vm8, %v1853_v50, %v788_v52  ;;  %v793_v16 = vsel %vm2354_vm8, %v1854_v53, %v792_v55  ;;  %v2481_v22 = vld [vmem:[#allocation2 + $0x2c] sm:$0x1]  ;;  %v571_v27 = vld [vmem:[#allocation2 + $0x20] sm:$0xe] }
  0x3b   : > { %v1852_v21 = vrot.slane %v755_v61, 9  ;;  %v1888_v29 = vcombine.low %v789_v11, %v793_v16  ;;  %v781_v30 = vsel %vm2354_vm8, %v1851_v63, %v780_v59  ;;  %v572_v31 = vld [vmem:[#allocation2 + $0x28] sm:$0xe]  ;;  %v1847_v23 = vrot.slane %v571_v27, 9  ;;  %v2489_v36 = vld [vmem:[#allocation2 + $0x14] sm:$0x1] }
  0x3c   : > { %v612_v35 = vrot.slane %v2470_v3, 5  ;;  %1047 = vrot.lane.b32.xlu0 %v1875_v5, %s2145_s19  ;;  %v1848_v40 = vrot.slane %v572_v31, 9  ;;  %v616_v42 = vrot.slane %v2481_v22, 5  ;;  %v2495_v44 = vld [vmem:[#allocation2 + $0x1c] sm:$0x1]  ;;  %v848_v50 = vor.u32 %v2444_v34, %v2442_v32  ;;  %v2035_v11 = vld [vmem:[%s3040_s4 + $0x30] sm:$0xff]  }
  0x3d   : > { %v785_v37 = vsel %vm2354_vm8, %v1852_v21, %v784_v1  ;;  %v569_v47 = vld [vmem:[#allocation2 + $0x10] sm:$0xe]  ;;  %v570_v55 = vld [vmem:[#allocation2 + $0x18] sm:$0xe]  ;;  %v604_v59 = vrot.slane %v2489_v36, 5  ;;  %v608_v1 = vrot.slane %v2495_v44, 5  ;;  %1502 = vmatpush1.bf16.msra.mxu1 %v2035_v11 }
  0x3e   : > { %v1887_v52 = vcombine.low %v781_v30, %v785_v37  ;;  %v613_v53 = vsel %vm2354_vm8, %v1847_v23, %v612_v35  ;;  %v1845_v57 = vrot.slane %v569_v47, 9  ;;  %v2502_v60 = vld [vmem:[#allocation2 + $0x8] sm:$0xf]  ;;  %1117 = vrot.lane.b32.xlu1 %v1888_v29, %s2146_s20  ;;  %v617_v61 = vsel %vm2354_vm8, %v1848_v40, %v616_v42  ;;  %1503 = vmatprep.subr.bf16.mxu1 %v2142_v0  ;;  %v2585_v32 = vld [vmem:[#allocation2 + $0x2c] sm:$0x1]  ;;  %s257_s9 = sand.u32 1, %s2132_s22  }
  0x3f   : > { %v1846_v63 = vrot.slane %v570_v55, 9  ;;  %v652_v5 = vshll.u32 %v2451_v43, 16  ;;  %v1877_v16 = vcombine.low %v613_v53, %v617_v61  ;;  %v666_v28 = vshll.u32 %v2461_v51, 16  ;;  %v2524_v43 = vld [vmem:[#allocation2 + $0x10] sm:$0xf]  ;;  %s2963_s12 = sshll.u32 %s257_s9, 5 }
  0x40   : > { %v605_v21 = vsel %vm2354_vm8, %v1845_v57, %v604_v59  ;;  %v461_v29 = vrot.slane %v459_v13, 5  ;;  %1115 = vrot.lane.b32.xlu0 %v1887_v52, %s2146_s20  ;;  %v467_v23 = vrot.slane %v465_v15, 5  ;;  %v470_v35 = vshrl.u32 %v2502_v60, 16  ;;  %v2540_v15 = vld [vmem:[#allocation2 + $0x18] sm:$0xf]  ;;  %s1946_s28 = sshll.u32 %s2208_s25, 9 }
  0x41   : > { %v609_v30 = vsel %vm2354_vm8, %v1846_v63, %v608_v1  ;;  %v654_v31 = vrot.slane %v652_v5, 5  ;;  %v668_v40 = vrot.slane %v666_v28, 5  ;;  %v473_v13 = vshll.u32 %v2502_v60, 16  ;;  %v2555_v5 = vld [vmem:[#allocation2 + $0x14] sm:$0x1]  ;;  %s259_s29 = scalar_lea.vmem [#allocation3], %s2963_s12  ;;  %s2979_s25 = scalar_lea.hbm %s3042_s6, %s1946_s28 }
  0x42   : > { %v1876_v37 = vcombine.low %v605_v21, %v609_v30  ;;  %v462_v51 = vor.u32 %v461_v29, %v2373_v14  ;;  %1051 = vrot.lane.b32.xlu1 %v1877_v16, %s2145_s19  ;;  %v472_v47 = vrot.slane %v470_v35, 4  ;;  %v479_v41 = vshll.u32 %v2425_v12, 16  ;;  %v2037_v14 = vld [vmem:[%s3038_s2 + $0x38] sm:$0xff]   ;;  %s1760_s10 = sshll.u32 %s259_s29, 4  ;;  %s2981_s10 = int_to_ptr.vmem [resolvable:$true] %s1760_s10 }
  0x43   : > { %v655_v42 = vsel %vm2517_vm11, %v2421_v8, %v654_v31  ;;  %v484_v52 = vshrl.u32 %v2524_v43, 16  ;;  %v669_v53 = vsel %vm2517_vm11, %v2428_v19, %v668_v40  ;;  %v475_v57 = vrot.slane %v473_v13, 5  ;;  %v2038_v8 = vld [vmem:[%s3040_s4 + $0x38] sm:$0xff]   ;;  %1360 = vmatpush1.bf16.msra.mxu0 %v2037_v14 }
  0x44   : > { %v463_v55 = vrot.slane %v462_v51, 4  ;;  %v487_v59 = vshll.u32 %v2524_v43, 16  ;;  %1049 = vrot.lane.b32.xlu0 %v1876_v37, %s2145_s19  ;;  %v1883_v12 = vcombine.low %v655_v42, %v669_v53  ;;  %v481_v61 = vrot.slane %v479_v41, 5  ;;  %v2560_v28 = vld [vmem:[#allocation2 + $0x1c] sm:$0x1]  ;;  %1504 = vmatpush1.bf16.msra.mxu1 %v2038_v8  ;;  %v2040_v51 = vld [vmem:[%s3038_s2 + $0x40] sm:$0xff]  }
  0x45   : > { %v486_v63 = vrot.slane %v484_v52, 4  ;;  %v493_v1 = vshll.u32 %v2489_v36, 16  ;;  %v476_v11 = vor.u32 %v475_v57, %v472_v47  ;;  %v498_v21 = vshrl.u32 %v2540_v15, 16  ;;  %1361 = vmatprep.subr.bf16.mxu0 %v2142_v0  ;;  %1505 = vmatprep.subr.bf16.mxu1 %v2142_v0 }
  0x46   : > { %v468_v19 = vsel %vm2517_vm11, %v463_v55, %v467_v23  ;;  %v489_v16 = vrot.slane %v487_v59, 5  ;;  %1095 = vrot.lane.b32.xlu1 %v1883_v12, %s2147_s16  ;;  %v501_v36 = vshll.u32 %v2540_v15, 16  ;;  %v507_v30 = vshll.u32 %v2495_v44, 16  ;;  %v2583_v55 = vld [vmem:[#allocation2 + $0x24] sm:$0x1] }
  0x47   : > { %v495_v29 = vrot.slane %v493_v1, 5  ;;  %v835_v31 = vrot.slane %v834_v4, 4  ;;  %v477_v23 = vrot.slane %v476_v11, 4  ;;  %v500_v37 = vrot.slane %v498_v21, 4  ;;  %1362 = vmatpush1.bf16.msra.mxu0 %v2040_v51 }
  0x48   : > { %v490_v35 = vor.u32 %v489_v16, %v486_v63  ;;  %v837_v40 = vshll.u32 %v2555_v5, 16  ;;  %v503_v13 = vrot.slane %v501_v36, 5  ;;  %v509_v42 = vrot.slane %v507_v30, 5  ;;  %v2602_v63 = vld [vmem:[#allocation2 + $0x28] sm:$0xf] }
  0x49   : > { %v849_v44 = vrot.slane %v848_v50, 4  ;;  %v851_v20 = vshll.u32 %v2560_v28, 16  ;;  %v482_v0 = vsel %vm2517_vm11, %v477_v23, %v481_v61  ;;  %v677_v47 = vor.u32 %v2449_v39, %v2447_v38  ;;  %v2593_v39 = vld [vmem:[#allocation2 + $0x20] sm:$0xf]  ;;  %v639_v23 = vld [vmem:[#allocation2 + $0x34] sm:$0x1] }
  0x4a   : > { %v491_v26 = vrot.slane %v490_v35, 4  ;;  %v839_v4 = vrot.slane %v837_v40, 5  ;;  %v1871_v41 = vcombine.low %v468_v19, %v482_v0  ;;  %v504_v52 = vor.u32 %v503_v13, %v500_v37  ;;  %v758_v40 = vld [vmem:[#allocation2 + $0x28] sm:$0xe] }
  0x4b   : > { %v853_v14 = vrot.slane %v851_v20, 5  ;;  %v680_v53 = vshll.u32 %v2433_v24, 16  ;;  %v678_v57 = vrot.slane %v677_v47, 4  ;;  %v691_v38 = vor.u32 %v2458_v46, %v2456_v45  ;;  %v2041_v24 = vld [vmem:[%s3040_s4 + $0x40] sm:$0xff]   ;;  %v759_v47 = vld [vmem:[#allocation2 + $0x30] sm:$0xe] }
  0x4c   : > { %v496_v34 = vsel %vm2517_vm11, %v491_v26, %v495_v29  ;;  %v840_v50 = vsel %vm2517_vm11, %v835_v31, %v839_v4  ;;  %1027 = vrot.lane.b32.xlu0 %v1871_v41, %s2148_s11  ;;  %v505_v59 = vrot.slane %v504_v52, 4  ;;  %v694_v61 = vshll.u32 %v2435_v25, 16  ;;  %1506 = vmatpush1.bf16.msra.mxu1 %v2041_v24  ;;  %v638_v31 = vld [vmem:[#allocation2 + $0x2c] sm:$0x1] }
  0x4d   : > { %v854_v8 = vsel %vm2517_vm11, %v849_v44, %v853_v14  ;;  %v682_v12 = vrot.slane %v680_v53, 5  ;;  %v692_v45 = vrot.slane %v691_v38, 4  ;;  %v865_v46 = vshll.u32 %v2583_v55, 16 }
  0x4e   : > { %v1895_v1 = vcombine.low %v840_v50, %v854_v8  ;;  %v879_v19 = vshll.u32 %v2585_v32, 16  ;;  %v718_v11 = vrot.slane %v716_v62, 5  ;;  %v510_v16 = vsel %vm2517_vm11, %v505_v59, %v509_v42  ;;  %v2633_v59 = vld [vmem:[#allocation2 + $0x30] sm:$0xf] }
  0x4f   : > { %v683_v21 = vsel %vm2517_vm11, %v678_v57, %v682_v12  ;;  %v696_v29 = vrot.slane %v694_v61, 5  ;;  %v1872_v25 = vcombine.low %v496_v34, %v510_v16  ;;  %v867_v36 = vrot.slane %v865_v46, 5  ;;  %v424_v46 = vld [vmem:[#allocation2 + $0x38] sm:$0xf] }
  0x50   : > { %v881_v30 = vrot.slane %v879_v19, 5  ;;  %1163 = vrot.lane.b32.xlu0 %v1895_v1, %s2149_s13  ;;  %v512_v48 = vshrl.u32 %v2593_v39, 16  ;;  %v515_v62 = vshll.u32 %v2593_v39, 16  ;;  %v521_v37 = vshll.u32 %v2470_v3, 16 }
  0x51   : > { %v697_v35 = vsel %vm2517_vm11, %v692_v45, %v696_v29  ;;  %1029 = vrot.lane.b32.xlu1 %v1872_v25, %s2148_s11  ;;  %v868_v13 = vsel %vm2517_vm11, %v2419_v7, %v867_v36  ;;  %v526_v44 = vshrl.u32 %v2602_v63, 16  ;;  %v529_v41 = vshll.u32 %v2602_v63, 16  ;;  %v2643_v29 = vld [vmem:[#allocation2 + $0x34] sm:$0x1]  ;;  %v2645_v25 = vld [vmem:[#allocation2 + $0x30] sm:$0xf] }
  0x52   : > { %v1884_v51 = vcombine.low %v683_v21, %v697_v35  ;;  %v882_v42 = vsel %vm2517_vm11, %v2410_v56, %v881_v30  ;;  %v514_v0 = vrot.slane %v512_v48, 4  ;;  %v517_v26 = vrot.slane %v515_v62, 5  ;;  %v450_v35 = vld [vmem:[#allocation2 + $0x34] sm:$0x1]  ;;  %v573_v48 = vld [vmem:[#allocation2 + $0x30] sm:$0xe] }
  0x53   : > { %v1896_v20 = vcombine.low %v868_v13, %v882_v42  ;;  %v523_v4 = vrot.slane %v521_v37, 5  ;;  %v528_v3 = vrot.slane %v526_v44, 4  ;;  %v535_v52 = vshll.u32 %v2481_v22, 16  ;;  %v300_v62 = vld [vmem:[%s2292_s15 + $0x1c] sm:$0xf]  ;;  %s2993_s15 = scalar_lea.sflag [#allocation4], %s257_s9 }
  0x54   : > { %v705_v14 = vor.u32 %v2412_v58, %v2405_v54  ;;  %1097 = vrot.lane.b32.xlu0 %v1884_v51, %s2147_s16  ;;  %v518_v7 = vor.u32 %v517_v26, %v514_v0  ;;  %v708_v53 = vshll.u32 %v638_v31, 16  ;;  %v719_v56 = vor.u32 %v718_v11, %v2423_v10  ;;  %v427_v10 = vld [vmem:[#allocation2 + $0x3c] sm:$0x1]  ;;  %v2659_v44 = vld [vmem:[#allocation2 + $0x48] sm:$0xf] }
  0x55   : > { %v722_v34 = vshll.u32 %v639_v23, 16  ;;  %1165 = vrot.lane.b32.xlu1 %v1896_v20, %s2149_s13  ;;  %v531_v50 = vrot.slane %v529_v41, 5  ;;  %v537_v57 = vrot.slane %v535_v52, 5  ;;  %v1855_v24 = vrot.slane %v758_v40, 9 }
  0x56   : > { %v706_v38 = vrot.slane %v705_v14, 4  ;;  %v519_v8 = vrot.slane %v518_v7, 4  ;;  %v710_v22 = vrot.slane %v708_v53, 5  ;;  %v720_v12 = vrot.slane %v719_v56, 4  ;;  %v2669_v53 = vld [vmem:[#allocation2 + $0x4c] sm:$0x1] }
  0x57   : > { %v724_v61 = vrot.slane %v722_v34, 5  ;;  %v532_v54 = vor.u32 %v531_v50, %v528_v3  ;;  %v796_v58 = vrot.slane %v638_v31, 5  ;;  %v1856_v1 = vrot.slane %v759_v47, 9 }
  0x58   : > { %v800_v45 = vrot.slane %v639_v23, 5  ;;  %v524_v19 = vsel %vm2517_vm11, %v519_v8, %v523_v4  ;;  %v711_v11 = vsel %vm2517_vm11, %v706_v38, %v710_v22  ;;  %v352_v21 = vrot.slane %v350_v18, 7  ;;  %v430_v38 = vld [vmem:[#allocation2 + $0x40] sm:$0xf] }
  0x59   : > { %v725_v16 = vsel %vm2517_vm11, %v720_v12, %v724_v61  ;;  %v533_v36 = vrot.slane %v532_v54, 4  ;;  %v797_v31 = vsel %vm2354_vm8, %v1855_v24, %v796_v58  ;;  %v884_v18 = vshrl.u32 %v2633_v59, 16  ;;  %v433_v24 = vld [vmem:[#allocation2 + $0x44] sm:$0x1] }
  0x5a   : > { %v1885_v30 = vcombine.low %v711_v11, %v725_v16  ;;  %v801_v23 = vsel %vm2354_vm8, %v1856_v1, %v800_v45  ;;  %v355_v37 = vor.u32 %v353_v49, %v352_v21  ;;  %v356_v40 = vrot.slane %v352_v21, 4 }
  0x5b   : > { %v538_v51 = vsel %vm2517_vm11, %v533_v36, %v537_v57  ;;  %v1889_v13 = vcombine.low %v797_v31, %v801_v23  ;;  %v887_v42 = vshll.u32 %v2633_v59, 16  ;;  %v886_v26 = vrot.slane %v884_v18, 4 }
  0x5c   : > { %1099 = vrot.lane.b32.xlu1 %v1885_v30, %s2147_s16  ;;  %v1873_v20 = vcombine.low %v524_v19, %v538_v51  ;;  %v425_v0 = vsel %vm2307_vm6, %v355_v37, %v424_v46  ;;  %v428_v9 = vsel %vm2317_vm7, %v356_v40, %v427_v10  ;;  %v893_v4 = vshll.u32 %v2643_v29, 16 }
  0x5d   : > { %426 = vst [vmem:[#allocation2 + $0x38] sm:$0xf] %v425_v0  ;;  %v889_v49 = vrot.slane %v887_v42, 5  ;;  %429 = vst [vmem:[#allocation2 + $0x3c] sm:$0x1] %v428_v9  ;;  %v540_v47 = vshrl.u32 %v2645_v25, 16  ;;  %v1868_v37 = vcombine.low %v2524_v43, %v2540_v15 }
  0x5e   : > { %v543_v3 = vshll.u32 %v2645_v25, 16  ;;  %1031 = vrot.lane.b32.xlu0 %v1873_v20, %s2148_s11  ;;  %v549_v41 = vshll.u32 %v450_v35, 16  ;;  %v1849_v52 = vrot.slane %v573_v48, 9  ;;  %v620_v14 = vrot.slane %v450_v35, 5 }
  0x5f   : > { %v358_v7 = vshrl.u32 %v300_v62, 16  ;;  %v890_v56 = vor.u32 %v889_v49, %v886_v26  ;;  %v542_v34 = vrot.slane %v540_v47, 4  ;;  %v361_v57 = vshll.u32 %v300_v62, 16 }
  0x60   : > { %v545_v50 = vrot.slane %v543_v3, 5  ;;  %v973_v8 = vrot.slane %v2583_v55, 5  ;;  %v926_v12 = vshrl.u32 %v2659_v44, 16  ;;  %v977_v61 = vrot.slane %v2585_v32, 5 }
  0x61   : > { %v360_v22 = vrot.slane %v358_v7, 7  ;;  %v2674_v54 = vrot.slane %v893_v4, 5  ;;  %v2676_v1 = vrot.slane %v549_v41, 5  ;;  %v2679_v45 = vrot.slane %v890_v56, 4 }
  0x62   : > { %v546_v58 = vor.u32 %v545_v50, %v542_v34  ;;  %1119 = vrot.lane.b32.xlu0 %v1889_v13, %s2146_s20  ;;  %v929_v19 = vshll.u32 %v2659_v44, 16  ;;  %v2686_v16 = vsel %vm2354_vm8, %v1849_v52, %v620_v14  ;;  %v2688_v21 = vrot.slane %v926_v12, 4 }
  0x63   : > { %v363_v46 = vor.u32 %v361_v57, %v360_v22  ;;  %v364_v10 = vrot.slane %v360_v22, 4  ;;  %v935_v36 = vshll.u32 %v2669_v53, 16  ;;  %v1867_v62 = vcombine.low %v2345_v2, %v2502_v60 }
  0x64   : > { %v2682_v11 = vrot.slane %v546_v58, 4  ;;  %v816_v30 = vld [vmem:[#allocation2 + $0x38] sm:$0xf]  ;;  %v2691_v31 = vld [vmem:[#allocation2 + $0x3c] sm:$0x1]  ;;  %v896_v17 = vsel %vm2517_vm11, %v2679_v45, %v2674_v54  ;;  %v2711_v26 = vrot.slane %v929_v19, 5 }
  0x65   : > { %v2693_v23 = vld [vmem:[#allocation2 + $0x38] sm:$0xf]  ;;  %v431_v35 = vsel %vm2307_vm6, %v363_v46, %v430_v38  ;;  %v434_v48 = vsel %vm2317_vm7, %v364_v10, %v433_v24  ;;  %v898_v40 = vshrl.u32 %v816_v30, 16  ;;  %v901_v18 = vshll.u32 %v816_v30, 16  ;;  %v451_v42 = vld [vmem:[#allocation2 + $0x3c] sm:$0x1] }
  0x66   : > { %v1893_v51 = vcombine.low %v2633_v59, %v816_v30  ;;  %v907_v13 = vshll.u32 %v2691_v31, 16  ;;  %432 = vst [vmem:[#allocation2 + $0x40] sm:$0xf] %v431_v35  ;;  %435 = vst [vmem:[#allocation2 + $0x44] sm:$0x1] %v434_v48  ;;  %v554_v33 = vshrl.u32 %v2693_v23, 16  ;;  %v552_v59 = vsel %vm2517_vm11, %v2682_v11, %v2676_v1 }
  0x67   : > { %v557_v20 = vshll.u32 %v2693_v23, 16  ;;  %v574_v0 = vld [vmem:[#allocation2 + $0x38] sm:$0xe]  ;;  %v900_v9 = vrot.slane %v898_v40, 4  ;;  %v903_v49 = vrot.slane %v901_v18, 5  ;;  %v563_v4 = vshll.u32 %v451_v42, 16 }
  0x68   : > { %1147 = vrot.lane.b32.xlu1 %v1893_v51, %s2143_s18  ;;  %v2718_v47 = vld [vmem:[#allocation2 + $0x38] sm:$0xf]  ;;  %v556_v3 = vrot.slane %v554_v33, 4  ;;  %v1850_v52 = vrot.slane %v574_v0, 9  ;;  %v624_v14 = vrot.slane %v451_v42, 5  ;;  %v909_v34 = vrot.slane %v907_v13, 5 }
  0x69   : > { %v559_v41 = vrot.slane %v557_v20, 5  ;;  %v640_v7 = vld [vmem:[#allocation2 + $0x3c] sm:$0x1]  ;;  %v904_v56 = vor.u32 %v903_v49, %v900_v9  ;;  %v727_v50 = vshrl.u32 %v2718_v47, 16  ;;  %v730_v57 = vshll.u32 %v2718_v47, 16 }
  0x6a   : > { %v760_v38 = vld [vmem:[#allocation2 + $0x38] sm:$0xe]  ;;  %v565_v22 = vrot.slane %v563_v4, 5  ;;  %v625_v12 = vsel %vm2354_vm8, %v1850_v52, %v624_v14  ;;  %v736_v54 = vshll.u32 %v640_v7, 16  ;;  %v1869_v48 = vcombine.low %v2593_v39, %v2602_v63 }
  0x6b   : > { %v560_v24 = vor.u32 %v559_v41, %v556_v3  ;;  %v905_v58 = vrot.slane %v904_v56, 4  ;;  %v729_v1 = vrot.slane %v727_v50, 4  ;;  %v732_v45 = vrot.slane %v730_v57, 5 }
  0x6c   : > { %v1857_v46 = vrot.slane %v760_v38, 9  ;;  %v1878_v19 = vcombine.low %v2686_v16, %v625_v12  ;;  %v738_v35 = vrot.slane %v736_v54, 5  ;;  %v932_v42 = vor.u32 %v2711_v26, %v2688_v21 }
  0x6d   : > { %v561_v10 = vrot.slane %v560_v24, 4  ;;  %v633_v11 = vld [vmem:[#allocation2 + $0x40] sm:$0xf]  ;;  %v641_v30 = vld [vmem:[#allocation2 + $0x44] sm:$0x1]  ;;  %v910_v40 = vsel %vm2517_vm11, %v905_v58, %v909_v34  ;;  %v733_v16 = vor.u32 %v732_v45, %v729_v1  ;;  %v804_v41 = vrot.slane %v640_v7, 5 }
  0x6e   : > { %v741_v18 = vshrl.u32 %v633_v11, 16  ;;  %v744_v51 = vshll.u32 %v633_v11, 16  ;;  %v761_v13 = vld [vmem:[#allocation2 + $0x40] sm:$0xe]  ;;  %v1897_v33 = vcombine.low %v896_v17, %v910_v40  ;;  %v750_v0 = vshll.u32 %v641_v30, 16 }
  0x6f   : > { %v566_v20 = vsel %vm2517_vm11, %v561_v10, %v565_v22  ;;  %v2733_v9 = vld [vmem:[#allocation2 + $0x40] sm:$0xf]  ;;  %v2735_v52 = vld [vmem:[#allocation2 + $0x44] sm:$0x1]  ;;  %v1882_v14 = vcombine.low %v2718_v47, %v633_v11  ;;  %v734_v56 = vrot.slane %v733_v16, 4  ;;  %v1858_v21 = vrot.slane %v761_v13, 9 }
  0x70   : > { %v1874_v49 = vcombine.low %v552_v59, %v566_v20  ;;  %v743_v4 = vrot.slane %v741_v18, 4  ;;  %v746_v3 = vrot.slane %v744_v51, 5  ;;  %1167 = vrot.lane.b32.xlu0 %v1897_v33, %s2149_s13  ;;  %v808_v17 = vrot.slane %v641_v30, 5  ;;  %v939_v58 = vld [vmem:[#allocation2 + $0x10] sm:$0xe] }
  0x71   : > { %v752_v34 = vrot.slane %v750_v0, 5  ;;  %v912_v50 = vshrl.u32 %v2733_v9, 16  ;;  %v915_v59 = vshll.u32 %v2733_v9, 16  ;;  %v805_v7 = vsel %vm2354_vm8, %v1857_v46, %v804_v41  ;;  %v940_v11 = vld [vmem:[#allocation2 + $0x18] sm:$0xe] }
  0x72   : > { %1033 = vrot.lane.b32.xlu1 %v1874_v49, %s2148_s11  ;;  %v747_v26 = vor.u32 %v746_v3, %v743_v4  ;;  %v809_v57 = vsel %vm2354_vm8, %v1858_v21, %v808_v17  ;;  %v921_v38 = vshll.u32 %v2735_v52, 16  ;;  %v937_v47 = vrot.slane %v935_v36, 5  ;;  %v941_v13 = vld [vmem:[#allocation2 + $0x20] sm:$0xe]  ;;  %v943_v20 = vld [vmem:[#allocation2 + $0x30] sm:$0xe] }
  0x73   : > { %v739_v24 = vsel %vm2517_vm11, %v734_v56, %v738_v35  ;;  %v914_v12 = vrot.slane %v912_v50, 4  ;;  %v917_v54 = vrot.slane %v915_v59, 5  ;;  %v981_v1 = vrot.slane %v2643_v29, 5  ;;  %v944_v49 = vld [vmem:[#allocation2 + $0x38] sm:$0xe] }
  0x74   : > { %v748_v22 = vrot.slane %v747_v26, 4  ;;  %v985_v45 = vrot.slane %v2691_v31, 5  ;;  %1053 = vrot.lane.b32.xlu0 %v1878_v19, %s2145_s19  ;;  %v933_v46 = vrot.slane %v932_v42, 4  ;;  %v993_v10 = vrot.slane %v2669_v53, 5  ;;  %v942_v31 = vld [vmem:[#allocation2 + $0x28] sm:$0xe] }
  0x75   : > { %v1890_v30 = vcombine.low %v805_v7, %v809_v57  ;;  %v918_v35 = vor.u32 %v917_v54, %v914_v12  ;;  %v923_v40 = vrot.slane %v921_v38, 5  ;;  %v1859_v51 = vrot.slane %v939_v58, 9  ;;  %v945_v4 = vld [vmem:[#allocation2 + $0x40] sm:$0xe]  ;;  %v946_v56 = vld [vmem:[#allocation2 + $0x48] sm:$0xe] }
  0x76   : > { %1081 = vrot.lane.b32.xlu1 %v1882_v14, %s2144_s26  ;;  %v753_v36 = vsel %vm2517_vm11, %v748_v22, %v752_v34  ;;  %v965_v29 = vrot.slane %v2555_v5, 5  ;;  %v938_v19 = vsel %vm2517_vm11, %v933_v46, %v937_v47  ;;  %v1860_v53 = vrot.slane %v940_v11, 9  ;;  %s2150_s26 = smov [#allocation3]  }
  0x77   : > { %v1886_v18 = vcombine.low %v739_v24, %v753_v36  ;;  %v919_v33 = vrot.slane %v918_v35, 4  ;;  %v969_v42 = vrot.slane %v2560_v28, 5  ;;  %v1894_v16 = vcombine.low %v2733_v9, %v2659_v44  ;;  %s2082_s19 = sshll.u32 %s2150_s26, 4  ;;  %s2083_s19 = int_to_ptr.vmem [resolvable:$false] %s2082_s19 }
  0x78   : > { %v989_v0 = vrot.slane %v2735_v52, 5  ;;  %v966_v5 = vsel %vm2354_vm8, %v1859_v51, %v965_v29  ;;  %v1861_v41 = vrot.slane %v941_v13, 9  ;;  %v1862_v14 = vrot.slane %v942_v31, 9  ;;  %p2085_p0 = scmp.lt.s32.totalorder %s2981_s10, %s2083_s19 }
  0x79   : > { %1101 = vrot.lane.b32.xlu0 %v1886_v18, %s2147_s16  ;;  %v924_v3 = vsel %vm2517_vm11, %v919_v33, %v923_v40  ;;  %v970_v28 = vsel %vm2354_vm8, %v1860_v53, %v969_v42  ;;  %v1870_v52 = vcombine.low %v2645_v25, %v2693_v23  ;;  %v1863_v21 = vrot.slane %v943_v20, 9  ;;  %v2844_v23 = vld [vmem:[%s3039_s3] ss:$0 sm:$0xff] }
  0x7a   : > { %1121 = vrot.lane.b32.xlu1 %v1890_v30, %s2146_s20  ;;  %v1898_v44 = vcombine.low %v924_v3, %v938_v19  ;;  %v1899_v9 = vcombine.low %v966_v5, %v970_v28  ;;  %v974_v17 = vsel %vm2354_vm8, %v1861_v41, %v973_v8  ;;  %v978_v27 = vsel %vm2354_vm8, %v1862_v14, %v977_v61  ;;  %s2084_s20 = scalar_lea.vmem %s2083_s19, 1024 }
  0x7b   : > { %v1864_v26 = vrot.slane %v944_v49, 9  ;;  %v1865_v34 = vrot.slane %v945_v4, 9  ;;  %v1900_v50 = vcombine.low %v974_v17, %v978_v27  ;;  %v982_v59 = vsel %vm2354_vm8, %v1863_v21, %v981_v1 }
  0x7c   : > { %1913 = vmatprep.mubr.msk.bf16.mxu0 %vm1183_vm12, %v1899_v9  ;;  %v1866_v7 = vrot.slane %v946_v56, 9  ;;  %1927 = vmatprep.mubr.msk.bf16.mxu1 %vm1183_vm12, %v1899_v9  ;;  %vm1196_vm13 = vcmask 261120   ;;  %vm1205_vm14 = vcmask 392192   ;;  %vm1214_vm15 = vcmask 523264  }
  0x7d   : > { %1149 = vrot.lane.b32.xlu0 %v1894_v16, %s2143_s18  ;;  %v986_v55 = vsel %vm2354_vm8, %v1864_v26, %v985_v45  ;;  %v990_v32 = vsel %vm2354_vm8, %v1865_v34, %v989_v0  ;;  %vm1223_vm1 = vcmask 654336   ;;  %vm1232_vm2 = vcmask 785408   ;;  %s2078_s18 = scalar_lea.vmem %s2981_s10, 512 }
  0x7e   : > { %1169 = vrot.lane.b32.xlu1 %v1898_v44, %s2149_s13  ;;  %v1901_v8 = vcombine.low %v982_v59, %v986_v55  ;;  %v994_v61 = vsel %vm2354_vm8, %v1866_v7, %v993_v10  ;;  %vm1241_vm3 = vcmask 916480   ;;  %p2079_p11 = scmp.ne.s32.totalorder %s2981_s10, %s2078_s18  ;;  %p2086_p1 = scmp.lt.s32.totalorder %s2084_s20, %s2078_s18 }
  0x7f   : > { %v1902_v57 = vcombine.low %v990_v32, %v994_v61 }
  0x80   : > { %p2080_p12 = pnand %p2079_p11, %p2225_p5  ;;  %p2087_p2 = por %p2086_p1, %p2085_p0 }
  0x82   : > { %p2081_p13 = pneg %p2080_p12 }
  0x84   : > { %p2088_p3 = pnand %p2087_p2, %p2081_p13 }
  0x9e   : > { %v1146_v38 = vpop.permute.xlu0 %1145 }
  0xa2   : > { %v1076_v47 = vpop.permute.xlu1 %1075 }
  0xa5   : > { %v1080_v24 = vpop.permute.xlu0 %1079 }
  0xa8   : > { %v1144_v22 = vpop.permute.xlu1 %1143 }
  0xac   : > { %v1078_v12 = vpop.permute.xlu1 %1077 }
  0xae   : > { %v1048_v54 = vpop.permute.xlu0 %1047 }
  0xb0   : > { %v1118_v58 = vpop.permute.xlu1 %1117 }
  0xb2   : > { %v1116_v1 = vpop.permute.xlu0 %1115 }
  0xb4   : > { %v1052_v46 = vpop.permute.xlu1 %1051 }
  0xb6   : > { %v1050_v11 = vpop.permute.xlu0 %1049 }
  0xb8   : > { %v1096_v36 = vpop.permute.xlu1 %1095 }
  0xbe   : > { %v1028_v45 = vpop.permute.xlu0 %1027 }
  0xbf   : > { %v1186_v6 = vsel %vm1183_vm12, %v1867_v62, %v1028_v45 }
  0xc0   : > { %v1198_v10 = vsel %vm1196_vm13, %v1186_v6, %v1048_v54 }
  0xc1   : > { %v1207_v30 = vsel %vm1205_vm14, %v1198_v10, %v1076_v47 }
  0xc2   : > { %v1164_v35 = vpop.permute.xlu0 %1163  ;;  %v1216_v40 = vsel %vm1214_vm15, %v1207_v30, %v1096_v36 }
  0xc3   : > { %v1030_v18 = vpop.permute.xlu1 %1029  ;;  %v1225_v51 = vsel %vm1223_vm1, %v1216_v40, %v1116_v1 }
  0xc4   : > { %v1189_v2 = vsel %vm1183_vm12, %v1868_v37, %v1030_v18  ;;  %v1234_v60 = vsel %vm1232_vm2, %v1225_v51, %v1144_v22 }
  0xc5   : > { %v1200_v62 = vsel %vm1196_vm13, %v1189_v2, %v1050_v11  ;;  %v1243_v29 = vsel %vm1241_vm3, %v1234_v60, %v1164_v35 }
  0xc6   : > { %1378 = vmatmul.mubr.bf16.vlgmr.msra.gmra.mrb[0].mxu0 %v1243_v29  ;;  %1522 = vmatmul.mubr.bf16.vlgmr.msra.gmra.mrb[0].mxu1 %v1243_v29  ;;  %v1209_v13 = vsel %vm1205_vm14, %v1200_v62, %v1078_v12  ;;  %v1098_v31 = vpop.permute.xlu0 %1097 }
  0xc7   : > { %v1218_v33 = vsel %vm1214_vm15, %v1209_v13, %v1098_v31  ;;  %1914 = vmatprep.mubr.msk.bf16.mxu0 %vm1183_vm12, %v1900_v50  ;;  %1928 = vmatprep.mubr.msk.bf16.mxu1 %vm1183_vm12, %v1900_v50  ;;  %v1166_v37 = vpop.permute.xlu1 %1165 }
  0xc8   : > { %v1227_v43 = vsel %vm1223_vm1, %v1218_v33, %v1118_v58 }
  0xc9   : > { %v1236_v15 = vsel %vm1232_vm2, %v1227_v43, %v1146_v38 }
  0xca   : > { %v1246_v19 = vsel %vm1241_vm3, %v1236_v15, %v1166_v37 }
  0xce   : > { %1386 = vmatmul.mubr.bf16.gmra.mrb[4].mxu0 %v1246_v19  ;;  %1530 = vmatmul.mubr.bf16.gmra.mrb[4].mxu1 %v1246_v19  ;;  %v1100_v16 = vpop.permute.xlu1 %1099 }
  0xcf   : > { %1915 = vmatprep.mubr.msk.bf16.mxu0 %vm1183_vm12, %v1901_v8  ;;  %1929 = vmatprep.mubr.msk.bf16.mxu1 %vm1183_vm12, %v1901_v8 }
  0xd0   : > { %v1032_v53 = vpop.permute.xlu0 %1031 }
  0xd1   : > { %v1192_v42 = vsel %vm1183_vm12, %v1869_v48, %v1032_v53 }
  0xd2   : > { %v1202_v20 = vsel %vm1196_vm13, %v1192_v42, %v1052_v46 }
  0xd3   : > { %v1211_v0 = vsel %vm1205_vm14, %v1202_v20, %v1080_v24 }
  0xd4   : > { %v1220_v5 = vsel %vm1214_vm15, %v1211_v0, %v1100_v16  ;;  %v1120_v49 = vpop.permute.xlu0 %1119 }
  0xd5   : > { %v1229_v3 = vsel %vm1223_vm1, %v1220_v5, %v1120_v49 }
  0xda   : > { %v1148_v4 = vpop.permute.xlu1 %1147 }
  0xdb   : > { %v1238_v28 = vsel %vm1232_vm2, %v1229_v3, %v1148_v4 }
  0xe2   : > { %v1168_v41 = vpop.permute.xlu0 %1167 }
  0xe3   : > { %v1249_v56 = vsel %vm1241_vm3, %v1238_v28, %v1168_v41 }
  0xe4   : > { %v1034_v14 = vpop.permute.xlu1 %1033  ;;  %1394 = vmatmul.mubr.bf16.gmra.mrb[8].mxu0 %v1249_v56  ;;  %1538 = vmatmul.mubr.bf16.gmra.mrb[8].mxu1 %v1249_v56 }
  0xe5   : > { %1916 = vmatprep.mubr.msk.bf16.mxu0 %vm1183_vm12, %v1902_v57  ;;  %1930 = vmatprep.mubr.msk.bf16.mxu1 %vm1183_vm12, %v1902_v57  ;;  %v1195_v39 = vsel %vm1183_vm12, %v1870_v52, %v1034_v14 }
  0xe6   : > { %v1054_v63 = vpop.permute.xlu0 %1053 }
  0xe7   : > { %v1204_v48 = vsel %vm1196_vm13, %v1195_v39, %v1054_v63 }
  0xe8   : > { %v1082_v44 = vpop.permute.xlu1 %1081 }
  0xe9   : > { %v1213_v9 = vsel %vm1205_vm14, %v1204_v48, %v1082_v44 }
  0xeb   : > { %v1102_v21 = vpop.permute.xlu0 %1101 }
  0xec   : > { %v1222_v17 = vsel %vm1214_vm15, %v1213_v9, %v1102_v21  ;;  %v1122_v27 = vpop.permute.xlu1 %1121 }
  0xed   : > { %v1231_v26 = vsel %vm1223_vm1, %v1222_v17, %v1122_v27 }
  0xef   : > { %v1150_v34 = vpop.permute.xlu0 %1149 }
  0xf0   : > { %v1240_v50 = vsel %vm1232_vm2, %v1231_v26, %v1150_v34  ;;  %v1170_v59 = vpop.permute.xlu1 %1169 }
  0xf1   : > { %v1252_v25 = vsel %vm1241_vm3, %v1240_v50, %v1170_v59 }
  0xf2   : > { %1402 = vmatmul.mubr.bf16.gmra.mrb[12].mxu0 %v1252_v25  ;;  %1546 = vmatmul.mubr.bf16.gmra.mrb[12].mxu1 %v1252_v25 }
 0x199   : > { %v1379_v52 = vpop.f32.mrb[0].mxu0  ;;  %v2846_v7 = vpop.f32.mrb[0].mxu1 }
 0x19a   : > { %v2849_v55 = vadd.f32 %v2844_v23, %v1379_v52  ;;  %v1381_v32 = vpop.f32.mrb[1].mxu0  ;;  %v1525_v8 = vpop.f32.mrb[1].mxu1 }
 0x19b   : > { %v1382_v61 = vpop.f32.mrb[2].mxu0  ;;  %v2851_v57 = vpop.f32.mrb[2].mxu1 }
 0x19c   : > { %v1575_v38 = vmul.f32 %v2849_v55, %v2849_v55  ;;  %v2856_v47 = vadd.f32 %v2844_v23, %v1382_v61  ;;  %v1384_v24 = vpop.f32.mrb[3].mxu0  ;;  %v1528_v22 = vpop.f32.mrb[3].mxu1  ;;  %v1554_v12 = vsel %vm1183_vm12, %v2849_v55, 0.0 }
 0x19d   : > { %v1917_v22 = vld [vmem:[%s3041_s5] ss:$0 sm:$0xff] }
 0x19e   : > { %v1555_v54 = vsel %vm1183_vm12, %v2856_v47, 0.0  ;;  %v1576_v58 = vmul.f32 %v2856_v47, %v2856_v47  ;;  %v1583_v46 = vsel %vm1183_vm12, %v1575_v38, 0.0 }
 0x19f   : > { %v1556_v1 = vadd.f32 %v1555_v54, %v1554_v12 }
 0x1a0   : > { %v1584_v11 = vsel %vm1183_vm12, %v1576_v58, 0.0 }
 0x1a1   : > { %v1585_v36 = vadd.f32 %v1584_v11, %v1583_v46  ;;  %v1387_v45 = vpop.f32.mrb[4].mxu0  ;;  %v1531_v6 = vpop.f32.mrb[4].mxu1  ;;  %v1524_v11 = vadd.f32 %v1917_v22, %v2846_v7 }
 0x1a2   : > { %v2867_v10 = vadd.f32 %v2844_v23, %v1387_v45  ;;  %v1389_v30 = vpop.f32.mrb[5].mxu0  ;;  %v1533_v35 = vpop.f32.mrb[5].mxu1 }
 0x1a3   : > { %v1390_v40 = vpop.f32.mrb[6].mxu0  ;;  %v1534_v18 = vpop.f32.mrb[6].mxu1  ;;  %v1527_v30 = vadd.f32 %v1917_v22, %v2851_v57  ;;  %v1532_v35 = vadd.f32 %v1917_v22, %v1531_v6 }
 0x1a4   : > { %v1557_v51 = vsel %vm1183_vm12, %v2867_v10, 0.0  ;;  %v1577_v2 = vmul.f32 %v2867_v10, %v2867_v10  ;;  %v2874_v60 = vadd.f32 %v2844_v23, %v1390_v40  ;;  %v1392_v62 = vpop.f32.mrb[7].mxu0  ;;  %v1536_v29 = vpop.f32.mrb[7].mxu1 }
 0x1a5   : > { %v1558_v13 = vadd.f32 %v1557_v51, %v1556_v1  ;;  %v1931_v62 = vmul.f32 -1.442695, %v1524_v11  ;;  %v1535_v29 = vadd.f32 %v1917_v22, %v1534_v18  ;;  %v2950_v11 = vld [vmem:[%s269_s17 + $0x18] sm:$0xff]  }
 0x1a6   : > { %v1586_v31 = vsel %vm1183_vm12, %v1577_v2, 0.0  ;;  %v1559_v33 = vsel %vm1183_vm12, %v2874_v60, 0.0  ;;  %v1578_v43 = vmul.f32 %v2874_v60, %v2874_v60 }
 0x1a7   : > { %v1587_v15 = vadd.f32 %v1586_v31, %v1585_v36  ;;  %v1560_v37 = vadd.f32 %v1559_v33, %v1558_v13  ;;  %v1932_v31 = vmul.f32 -1.442695, %v1527_v30  ;;  %2044 = vpow2.f32 %v1931_v62 }
 0x1a8   : > { %v1588_v19 = vsel %vm1183_vm12, %v1578_v43, 0.0  ;;  %v1934_v57 = vmul.f32 -1.442695, %v1535_v29  ;;  %v1962_v62 = vunpack.c.h.bf16 %v2950_v11 }
 0x1a9   : > { %v1589_v53 = vadd.f32 %v1588_v19, %v1587_v15  ;;  %v1933_v15 = vmul.f32 -1.442695, %v1532_v35  ;;  %2046 = vpow2.f32 %v1932_v31 }
 0x1ab   : > { %2048 = vpow2.f32 %v1933_v15 }
 0x1b7   : > { %v1395_v42 = vpop.f32.mrb[8].mxu0  ;;  %v1539_v20 = vpop.f32.mrb[8].mxu1 }
 0x1b8   : > { %v2883_v16 = vadd.f32 %v2844_v23, %v1395_v42  ;;  %v1397_v0 = vpop.f32.mrb[9].mxu0  ;;  %v1541_v5 = vpop.f32.mrb[9].mxu1  ;;  %v1540_v33 = vadd.f32 %v1917_v22, %v1539_v20 }
 0x1b9   : > { %v1398_v49 = vpop.f32.mrb[10].mxu0  ;;  %v1542_v4 = vpop.f32.mrb[10].mxu1 }
 0x1ba   : > { %v1561_v3 = vsel %vm1183_vm12, %v2883_v16, 0.0  ;;  %v1579_v28 = vmul.f32 %v2883_v16, %v2883_v16  ;;  %v2890_v41 = vadd.f32 %v2844_v23, %v1398_v49  ;;  %v1400_v14 = vpop.f32.mrb[11].mxu0  ;;  %v1544_v56 = vpop.f32.mrb[11].mxu1  ;;  %v1543_v7 = vadd.f32 %v1917_v22, %v1542_v4 }
 0x1bb   : > { %v1562_v39 = vadd.f32 %v1561_v3, %v1560_v37  ;;  %v1935_v0 = vmul.f32 -1.442695, %v1540_v33 }
 0x1bc   : > { %v1590_v63 = vsel %vm1183_vm12, %v1579_v28, 0.0  ;;  %v1563_v48 = vsel %vm1183_vm12, %v2890_v41, 0.0  ;;  %v1580_v44 = vmul.f32 %v2890_v41, %v2890_v41  ;;  %v1936_v49 = vmul.f32 -1.442695, %v1543_v7 }
 0x1bd   : > { %v1591_v9 = vadd.f32 %v1590_v63, %v1589_v53  ;;  %v1564_v21 = vadd.f32 %v1563_v48, %v1562_v39 }
 0x1be   : > { %v1592_v17 = vsel %vm1183_vm12, %v1580_v44, 0.0 }
 0x1bf   : > { %v1593_v27 = vadd.f32 %v1592_v17, %v1591_v9 }
 0x1c5   : > { %v1403_v26 = vpop.f32.mrb[12].mxu0  ;;  %v1547_v34 = vpop.f32.mrb[12].mxu1 }
 0x1c6   : > { %v2899_v50 = vadd.f32 %v2844_v23, %v1403_v26  ;;  %v1405_v59 = vpop.f32.mrb[13].mxu0  ;;  %v1549_v25 = vpop.f32.mrb[13].mxu1  ;;  %v1548_v19 = vadd.f32 %v1917_v22, %v1547_v34 }
 0x1c7   : > { %v1406_v52 = vpop.f32.mrb[14].mxu0  ;;  %v1550_v32 = vpop.f32.mrb[14].mxu1 }
 0x1c8   : > { %v1565_v8 = vsel %vm1183_vm12, %v2899_v50, 0.0  ;;  %v1581_v61 = vmul.f32 %v2899_v50, %v2899_v50  ;;  %v1408_v38 = vpop.f32.mrb[15].mxu0  ;;  %v1552_v24 = vpop.f32.mrb[15].mxu1  ;;  %v2909_v54 = vadd.f32 %v2844_v23, %v1406_v52  ;;  %v1551_v2 = vadd.f32 %v1917_v22, %v1550_v32 }
 0x1c9   : > { %v1566_v12 = vadd.f32 %v1565_v8, %v1564_v21  ;;  %v1937_v18 = vmul.f32 -1.442695, %v1548_v19  ;;  %v2045_v26 = vpop.eup %2044 }
 0x1ca   : > { %v1594_v58 = vsel %vm1183_vm12, %v1581_v61, 0.0  ;;  %v1567_v46 = vsel %vm1183_vm12, %v2909_v54, 0.0  ;;  %v1582_v45 = vmul.f32 %v2909_v54, %v2909_v54  ;;  %v1938_v42 = vmul.f32 -1.442695, %v1551_v2  ;;  %v2047_v59 = vpop.eup %2046 }
 0x1cb   : > { %v1595_v1 = vadd.f32 %v1594_v58, %v1593_v27  ;;  %v1568_v36 = vadd.f32 %v1567_v46, %v1566_v12  ;;  %v2049_v25 = vpop.eup %2048  ;;  %v1674_v32 = vadd.f32 1.0, %v2045_v26  ;;  %v1675_v61 = vadd.f32 1.0, %v2047_v59  ;;  %v2944_v58 = vld [vmem:[%s269_s17] sm:$0xff]   ;;  %v2948_v46 = vld [vmem:[%s269_s17 + $0x10] sm:$0xff]  }
 0x1cc   : > { %v1596_v51 = vsel %vm1183_vm12, %v1582_v45, 0.0  ;;  %2050 = vpow2.f32 %v1938_v42  ;;  %v1676_v38 = vadd.f32 1.0, %v2049_v25  ;;  %v1950_v45 = vunpack.c.h.bf16 %v2944_v58 }
 0x1cd   : > { %v1569_v40 = vrot.slane %v1568_v36, 4  ;;  %v1597_v23 = vadd.f32 %v1596_v51, %v1595_v1  ;;  %2052 = vpow2.f32 %v1934_v57  ;;  %v2946_v1 = vld [vmem:[%s269_s17 + $0x8] sm:$0xff]   ;;  %v1957_v51 = vunpack.c.l.bf16 %v2948_v46 }
 0x1ce   : > { %2054 = vpow2.f32 %v1935_v0  ;;  %v1953_v30 = vunpack.c.l.bf16 %v2946_v1  ;;  %v1954_v35 = vunpack.c.h.bf16 %v2946_v1  ;;  %v1961_v2 = vunpack.c.l.bf16 %v2950_v11 }
 0x1cf   : > { %v1570_v13 = vadd.f32 %v1569_v40, %v1568_v36  ;;  %v1598_v43 = vrot.slane %v1597_v23, 4  ;;  %2056 = vpow2.f32 %v1936_v49  ;;  %v1949_v36 = vunpack.c.l.bf16 %v2944_v58 }
 0x1d0   : > { %2058 = vpow2.f32 %v1937_v18 }
 0x1d1   : > { %v1571_v37 = vrot.slane %v1570_v13, 2  ;;  %v1599_v53 = vadd.f32 %v1598_v43, %v1597_v23  ;;  %v1958_v23 = vunpack.c.h.bf16 %v2948_v46 }
 0x1d3   : > { %v1572_v6 = vadd.f32 %v1571_v37, %v1570_v13  ;;  %v1600_v5 = vrot.slane %v1599_v53, 2 }
 0x1d5   : > { %v1573_v3 = vrot.slane %v1572_v6, 1  ;;  %v1601_v28 = vadd.f32 %v1600_v5, %v1599_v53 }
 0x1d6   : > { %v2051_v52 = vpop.eup %2050 }
 0x1d7   : > { %v1574_v20 = vadd.f32 %v1573_v3, %v1572_v6  ;;  %v1602_v4 = vrot.slane %v1601_v28, 1  ;;  %v2053_v8 = vpop.eup %2052  ;;  %v1681_v24 = vadd.f32 1.0, %v2051_v52 }
 0x1d9   : > { %v2919_v14 = vmul.f32 0.015625, %v1574_v20  ;;  %v1603_v56 = vadd.f32 %v1602_v4, %v1601_v28 }
 0x1db   : > { %v1606_v39 = vmul.f32 %v2919_v14, %v2919_v14  ;;  %v1615_v63 = vsub.f32 %v2909_v54, %v2919_v14  ;;  %v1608_v48 = vsub.f32 %v2849_v55, %v2919_v14  ;;  %v1609_v44 = vsub.f32 %v2856_v47, %v2919_v14 }
 0x1dc   : > { %v1605_v9 = vmul.f32 0.015625, %v1603_v56  ;;  %v1610_v21 = vsub.f32 %v2867_v10, %v2919_v14  ;;  %v1611_v17 = vsub.f32 %v2874_v60, %v2919_v14  ;;  %v1612_v27 = vsub.f32 %v2883_v16, %v2919_v14  ;;  %v2055_v60 = vpop.eup %2054 }
 0x1dd   : > { %v1613_v34 = vsub.f32 %v2890_v41, %v2919_v14  ;;  %v1614_v55 = vsub.f32 %v2899_v50, %v2919_v14  ;;  %v2057_v16 = vpop.eup %2056  ;;  %v1677_v41 = vadd.f32 1.0, %v2053_v8  ;;  %v1678_v50 = vadd.f32 1.0, %v2055_v60 }
 0x1de   : > { %v1607_v47 = vsub.f32 %v1605_v9, %v1606_v39  ;;  %v2059_v22 = vpop.eup %2058  ;;  %v1679_v12 = vadd.f32 1.0, %v2057_v16 }
 0x1df   : > { %v1680_v54 = vadd.f32 1.0, %v2059_v22 }
 0x1e0   : > { %v1616_v10 = vadd.f32 1e-05, %v1607_v47 }
 0x1e2   : > { %2060 = vrsqrt.f32 %v1616_v10 }
 0x1e3   : > { %2062 = vrcp.f32 %v1674_v32 }
 0x1e4   : > { %2064 = vrcp.f32 %v1675_v61 }
 0x1e5   : > { %2066 = vrcp.f32 %v1676_v38 }
 0x1e6   : > { %2068 = vrcp.f32 %v1681_v24 }
 0x1e7   : > { %2070 = vrcp.f32 %v1677_v41 }
 0x1e8   : > { %2072 = vrcp.f32 %v1678_v50 }
 0x1e9   : > { %2074 = vrcp.f32 %v1679_v12 }
 0x1ea   : > { %2076 = vrcp.f32 %v1680_v54 }
 0x1ec   : > { %v2061_v40 = vpop.eup %2060 }
 0x1ed   : > { %v1625_v29 = vmul.f32 %v2061_v40, %v1615_v63  ;;  %v1618_v13 = vmul.f32 %v2061_v40, %v1608_v48  ;;  %v1619_v31 = vmul.f32 %v2061_v40, %v1609_v44  ;;  %v1620_v33 = vmul.f32 %v2061_v40, %v1610_v21  ;;  %v2063_v43 = vpop.eup %2062 }
 0x1ee   : > { %v1621_v15 = vmul.f32 %v2061_v40, %v1611_v17  ;;  %v1622_v7 = vmul.f32 %v2061_v40, %v1612_v27  ;;  %v1623_v37 = vmul.f32 %v2061_v40, %v1613_v34  ;;  %v1624_v19 = vmul.f32 %v2061_v40, %v1614_v55  ;;  %v2065_v53 = vpop.eup %2064 }
 0x1ef   : > { %vm1633_vm4 = vcmp.ge.f32.partialorder %v1625_v29, 0.0  ;;  %v1641_v42 = vmul.f32 0.01, %v1625_v29  ;;  %vm1626_vm5 = vcmp.ge.f32.partialorder %v1618_v13, 0.0  ;;  %vm1627_vm6 = vcmp.ge.f32.partialorder %v1619_v31, 0.0  ;;  %v2067_v57 = vpop.eup %2066 }
 0x1f0   : > { %vm1628_vm7 = vcmp.ge.f32.partialorder %v1620_v33, 0.0  ;;  %vm1629_vm8 = vcmp.ge.f32.partialorder %v1621_v15, 0.0  ;;  %vm1630_vm9 = vcmp.ge.f32.partialorder %v1622_v7, 0.0  ;;  %vm1631_vm10 = vcmp.ge.f32.partialorder %v1623_v37, 0.0  ;;  %v2069_v6 = vpop.eup %2068 }
 0x1f1   : > { %v1649_v0 = vsel %vm1633_vm4, %v1625_v29, %v1641_v42  ;;  %vm1632_vm11 = vcmp.ge.f32.partialorder %v1624_v19, 0.0  ;;  %v1634_v5 = vmul.f32 0.01, %v1618_v13  ;;  %v1635_v49 = vmul.f32 0.01, %v1619_v31  ;;  %v2071_v3 = vpop.eup %2070 }
 0x1f2   : > { %v1636_v18 = vmul.f32 0.01, %v1620_v33  ;;  %v1637_v28 = vmul.f32 0.01, %v1621_v15  ;;  %v1638_v20 = vmul.f32 0.01, %v1622_v7  ;;  %v1705_v4 = vmul.f32 %v2069_v6, %v1649_v0  ;;  %v2073_v14 = vpop.eup %2072 }
 0x1f3   : > { %v1639_v56 = vmul.f32 0.01, %v1623_v37  ;;  %v1640_v39 = vmul.f32 0.01, %v1624_v19  ;;  %v1642_v63 = vsel %vm1626_vm5, %v1618_v13, %v1634_v5  ;;  %v1643_v48 = vsel %vm1627_vm6, %v1619_v31, %v1635_v49  ;;  %v2075_v44 = vpop.eup %2074 }
 0x1f4   : > { %v1644_v9 = vsel %vm1628_vm7, %v1620_v33, %v1636_v18  ;;  %v1645_v21 = vsel %vm1629_vm8, %v1621_v15, %v1637_v28  ;;  %v1646_v17 = vsel %vm1630_vm9, %v1622_v7, %v1638_v20  ;;  %v1698_v27 = vmul.f32 %v2063_v43, %v1642_v63  ;;  %v2077_v26 = vpop.eup %2076 }
 0x1f5   : > { %v1647_v34 = vsel %vm1631_vm10, %v1623_v37, %v1639_v56  ;;  %v1648_v55 = vsel %vm1632_vm11, %v1624_v19, %v1640_v39  ;;  %v1699_v59 = vmul.f32 %v2065_v53, %v1643_v48  ;;  %v1700_v47 = vmul.f32 %v2067_v57, %v1644_v9 }
 0x1f6   : > { %v1701_v25 = vmul.f32 %v2071_v3, %v1645_v21  ;;  %v1702_v52 = vmul.f32 %v2073_v14, %v1646_v17  ;;  %v1703_v32 = vmul.f32 %v2075_v44, %v1647_v34  ;;  %v1704_v10 = vmul.f32 %v2077_v26, %v1648_v55 }
 0x1f7   : > { %v1722_v8 = vadd.f32 %v1949_v36, %v1698_v27  ;;  %v1723_v61 = vadd.f32 %v1950_v45, %v1699_v59  ;;  %v1724_v60 = vadd.f32 %v1953_v30, %v1700_v47  ;;  %v1729_v38 = vadd.f32 %v1962_v62, %v1705_v4 }
 0x1f8   : > { %v1725_v16 = vadd.f32 %v1954_v35, %v1701_v25  ;;  %v1726_v24 = vadd.f32 %v1957_v51, %v1702_v52  ;;  %v1727_v22 = vadd.f32 %v1958_v23, %v1703_v32  ;;  %v1728_v41 = vadd.f32 %v1961_v2, %v1704_v10 }
 0x1f9   : > { %v1730_v50 = vpack.c.bf16 %v1722_v8, %v1722_v8  ;;  %v1731_v12 = vpack.c.bf16 %v1723_v61, %v1723_v61  ;;  %v1732_v54 = vpack.c.bf16 %v1724_v60, %v1724_v60  ;;  %v1737_v58 = vpack.c.bf16 %v1729_v38, %v1729_v38 }
 0x1fa   : > { %v1733_v46 = vpack.c.bf16 %v1725_v16, %v1725_v16  ;;  %v1734_v11 = vpack.c.bf16 %v1726_v24, %v1726_v24  ;;  %v1735_v36 = vpack.c.bf16 %v1727_v22, %v1727_v22  ;;  %v1736_v45 = vpack.c.bf16 %v1728_v41, %v1728_v41 }
 0x1fb   : > { %1738 = vst.msk [vmem:[%s259_s29] sm:$0xf] %vm271_vm0, %v1730_v50  ;;  %1739 = vst.msk [vmem:[%s259_s29 + $0x4] sm:$0xf] %vm271_vm0, %v1731_v12 }
 0x1fc   : > { %1740 = vst.msk [vmem:[%s259_s29 + $0x8] sm:$0xf] %vm271_vm0, %v1732_v54  ;;  %1745 = vst.msk [vmem:[%s259_s29 + $0x1c] sm:$0xf] %vm271_vm0, %v1737_v58 }
 0x1fd   : > { %1741 = vst.msk [vmem:[%s259_s29 + $0xc] sm:$0xf] %vm271_vm0, %v1733_v46  ;;  %1742 = vst.msk [vmem:[%s259_s29 + $0x10] sm:$0xf] %vm271_vm0, %v1734_v11 }
 0x1fe   : > { %1743 = vst.msk [vmem:[%s259_s29 + $0x14] sm:$0xf] %vm271_vm0, %v1735_v36  ;;  %1744 = vst.msk [vmem:[%s259_s29 + $0x18] sm:$0xf] %vm271_vm0, %v1736_v45 }
 0x1ff   : > { %2091 = shalt.err (!%p2088_p3)
}
 0x200   : > { %s2092_s14 = scalar_lea.hbm %s2979_s25, 512  ;;  %s2096_s12 = scalar_lea.hbm %s3042_s6, 1024 }
 0x201   : > { %p2093_p4 = scmp.ne.s32.totalorder %s2979_s25, %s2092_s14  ;;  %p2097_p9 = scmp.lt.u32.totalorder %s2979_s25, %s3042_s6 }
 0x202   : > { %p2098_p10 = scmp.lt.u32.totalorder %s2096_s12, %s2092_s14  ;;  %p2100_p12 = scmp.lt.u32.totalorder %s2092_s14, %s2979_s25 }
 0x203   : > { %p2094_p7 = pnand %p2093_p4, %p2225_p5 }
 0x204   : > { %p2099_p11 = por %p2098_p10, %p2097_p9 }
 0x205   : > { %p2095_p8 = pneg %p2094_p7 }
 0x206   : > { %p2101_p13 = por %p2100_p12, %p2099_p11 }
 0x208   : > { %p2102_p0 = pnand %p2101_p13, %p2095_p8 }
 0x20a   : > { %2105 = shalt.err (!%p2102_p0)
}
 0x20b   : > { %s2151_s11 = smov 4  }
 0x20c   : > { %1966 = dma.vmem_to_hbm [thread:$0]  (%p2225_p5), %s2981_s10, 512, %s2979_s25, %s2993_s15, %s2147_s16, %s2147_s16, %s2151_s11  }
 0x20d PF: > { %p1972_p1 = scmp.ge.s32.totalorder %s2140_s24, 2  ;;  %s1775_s13 = sand.u32 1, %s2128_s21  }
 0x20e   : > { %s1776_s18 = scalar_lea.sflag [#allocation4], %s1775_s13 }
 0x20f   : > { %p1969_p2 = pnand %p1972_p1, %p2229_p6 }
 0x211   : > { %2123 = dma.done.wait (!%p1969_p2), %s1776_s18, 512  }
 0x212   : > { %2125 = vsyncadd (!%p1969_p2), %s1776_s18, 4294966784  ;;  %p16_p3 = scmp.ge.s32.totalorder %s2212_s27, 4   ;;  %s3053_s21 = smov %s2132_s22 }
 0x213   : > { %s3054_s22 = smov %s2136_s23  ;;  %s3055_s23 = smov %s2223_s30 }
 0x214   : > { %s3056_s24 = smov %s2212_s27  ;;  %18 = sbr.rel (!%p16_p3) target bundleno = 3 (0x3), region = 84 }
 0x21b   :  { %1781 = vsyncpa [#allocation4], 1 }
 0x21c   :  { %1783 = vsyncpa [#allocation4 + $0x1], 1 }

</bundles_post_ra>
